<compile_context>
chip_gen: v7x
topology: tpu7x:2x2x1
jax: 0.10.0
libtpu: 0.0.40
codegen_flags: <defaults>
</compile_context>

<pallas_src>
import functools

import jax
import jax.numpy as jnp
from jax import lax
from jax.experimental import pallas as pl
from jax.experimental.pallas import tpu as pltpu

KSIZE = 3            # depthwise kernel size (stride = 1, padding = KSIZE // 2)
PAD = KSIZE // 2     # = 1
HALO = 2 * PAD       # = 2 extra rows needed below each TH-row strip


def _dwsep_kernel(xm_ref, xh_ref, dw_ref, pw_ref, bias_ref, o_ref, *,
                  TH, W, compute_dtype):
    """Fused depthwise(3x3) + pointwise(1x1, BN-scale folded) + bias + ReLU6.

    xm_ref:   (1, TH,   Wp, Cin) bf16   main rows of the padded input strip
    xh_ref:   (1, HALO, Wp, Cin) bf16   HALO rows directly below the strip
    dw_ref:   (9, Cin)  compute dtype   depthwise taps, row-major (kh*3 + kw)
    pw_ref:   (Cin, Cout) bf16          pointwise weights pre-scaled by BN
    bias_ref: (1, Cout) f32             folded BN bias
    o_ref:    (TH*W, Cout)              flattened output strip (lane-dense)
    """
    cin = xm_ref.shape[-1]
    dw = dw_ref[...]                        # hoisted single load of the taps
    pw = pw_ref[...]
    bias = bias_ref[...]

    xm = xm_ref[0].astype(compute_dtype)    # (TH, Wp, Cin); no-op cast if bf16
    xh = xh_ref[0].astype(compute_dtype)    # (HALO, Wp, Cin)

    def dw_taps(x, out_rows):
        # x: (out_rows + HALO, Wp, Cin) -> (out_rows, W, Cin).
        acc = None
        for kw in range(KSIZE):
            # One W-shifted slice per kw (3 total), hoisted out of the kh loop;
            # kh shifts below are leading-axis slices (address offsets).  The
            # kw = 1, 2 slices are unaligned sublane slices (one relayout copy
            # each, now in compute_dtype); a pltpu.roll-based full-Wp variant
            # would trade those copies for two XLU rolls.
            xw = x[:, kw:kw + W, :]
            for kh in range(KSIZE):
                term = xw[kh:kh + out_rows] * dw[kh * KSIZE + kw].reshape(1, 1, cin)
                acc = term if acc is None else acc + term   # init from 1st tap
        return acc

    def pointwise(acc, rows):
        # Pointwise 1x1 conv == MXU matmul: bf16 operands, f32 accumulate.
        y = jnp.dot(acc.reshape(rows * W, cin).astype(jnp.bfloat16), pw,
                    preferred_element_type=jnp.float32)
        return jnp.clip(y + bias, 0.0, 6.0).astype(o_ref.dtype)

    # Output rows [0, TH - HALO): every tap row lives inside the main block.
    top = TH - HALO
    o_ref[:top * W, :] = pointwise(dw_taps(xm, top), top)

    # Output rows [TH - HALO, TH): tap rows straddle the main/halo boundary.
    # Only a tiny (2*HALO, Wp, Cin) block is assembled; no full-strip concat.
    x_bot = jnp.concatenate([xm[top:], xh], axis=0)
    o_ref[top * W:, :] = pointwise(dw_taps(x_bot, HALO), HALO)


def _device_kind():
    try:
        return jax.devices()[0].device_kind.lower()
    except Exception:
        return ""


def _generation_defaults():
    """(depthwise compute dtype, vmem cap bytes, two_tensorcores) per chip."""
    kind = _device_kind()
    if "v7" in kind:
        return jnp.bfloat16, 40 * 2**20, True     # 64 MiB/TC VMEM, 2 TCs
    if "v6" in kind:
        return jnp.bfloat16, 96 * 2**20, False    # 128 MiB VMEM, bf16 VALU
    if "v5" in kind or "v4" in kind:
        return jnp.float32, 64 * 2**20, False     # no bf16 VALU on v5e
    return jnp.float32, 32 * 2**20, False         # unknown: conservative


def _max_tile_h(W8, cin, cout, budget, cd_bytes, out_bytes):
    """Largest strip height whose per-step VMEM footprint fits the budget."""
    Wp = W8 + 2 * PAD
    per_row = (2 * 2 * Wp * cin                       # dbl-buffered bf16 input
               + 2 * W8 * cout * out_bytes            # dbl-buffered output
               + (KSIZE * Wp + W8) * cin * cd_bytes   # shifted slices + dw acc
               + 2 * W8 * cout * 4)                   # f32 matmul + epilogue
    fixed = (2 * HALO * Wp * cin * 2 * 2              # halo blocks (dbl-buf)
             + KSIZE * KSIZE * cin * cd_bytes + cin * cout * 2 + cout * 4)
    return int(max(4, min(128, (budget - fixed) // max(1, per_row))))


def _choose_tile_h(H, max_th, tile_h=None):
    """Even strip height >= 4, preferring divisors of H (no row padding)."""
    if tile_h is not None:
        th = int(tile_h)
        assert th >= 4 and th % 2 == 0, "tile_h must be even and >= 4"
        return th
    cap = min(max_th, H + (H % 2))
    cap = max(4, cap - cap % 2)
    for th in range(cap, 3, -2):
        if H % th == 0:
            return th
    return cap                    # no even divisor <= cap: pad H instead


def depthwise_separable_conv_nhwc(x_nhwc, dw_w, pw_w, gamma, beta, mean, var,
                                  eps=1e-5, tile_h=None, compute_dtype=None,
                                  out_dtype=jnp.bfloat16):
    """NHWC core entry point (inference-mode BN).

    x_nhwc: (N, H, W, Cin); dw_w: (Cin, 1, 3, 3); pw_w: (Cout, Cin, 1, 1);
    gamma/beta/mean/var: (Cout,).  Returns (N, H, W, Cout) in `out_dtype`
    (bf16 by default to halve writeback; use jnp.float32 for dtype parity).
    """
    N, H, W, Cin = x_nhwc.shape
    Cout = pw_w.shape[0]

    cd_default, vmem_cap, two_tc = _generation_defaults()
    cdtype = cd_default if compute_dtype is None else compute_dtype
    cd_bytes = jnp.dtype(cdtype).itemsize
    out_bytes = jnp.dtype(out_dtype).itemsize

    # ---- tiling: W padded to a sublane multiple, H padded to a strip multiple
    W8 = ((W + 7) // 8) * 8
    Wp = W8 + 2 * PAD
    max_th = _max_tile_h(W8, Cin, Cout, vmem_cap // 2, cd_bytes, out_bytes)
    TH = _choose_tile_h(H, max_th, tile_h)
    H_pad = ((H + TH - 1) // TH) * TH
    # v7x has two TensorCores: split a single-block grid so neither sits idle.
    if tile_h is None and two_tc and N * (H_pad // TH) == 1 and TH % 4 == 0 and TH >= 8:
        TH //= 2
    n_ht = H_pad // TH

    # ---- glue (plain JAX): bf16 spatial zero-pad + weight / BN folding ------
    x_pad = jnp.pad(x_nhwc.astype(jnp.bfloat16),
                    ((0, 0), (PAD, PAD + H_pad - H), (PAD, PAD + W8 - W), (0, 0)))
    dw_taps = jnp.transpose(dw_w[:, 0, :, :], (1, 2, 0)).reshape(
        KSIZE * KSIZE, Cin).astype(cdtype)                        # (9, Cin)
    inv = gamma / jnp.sqrt(var + eps)
    # TODO(synk): folding the BN scale quantizes it to bf16 with the pointwise
    #             weights; extreme per-channel scale ratios lose precision.
    pw_scaled = (jnp.transpose(pw_w[:, :, 0, 0], (1, 0))
                 * inv[None, :]).astype(jnp.bfloat16)             # (Cin, Cout)
    bias = (beta - mean * inv).reshape(1, Cout).astype(jnp.float32)

    kernel = functools.partial(_dwsep_kernel, TH=TH, W=W8, compute_dtype=cdtype)
    h_half = TH // 2      # halo block index stride (halo block is 2 rows tall)

    out_flat = pl.pallas_call(
        kernel,
        out_shape=jax.ShapeDtypeStruct((N * H_pad * W8, Cout), out_dtype),
        grid_spec=pltpu.PrefetchScalarGridSpec(
            num_scalar_prefetch=0,
            grid=(N, n_ht),
            in_specs=[
                # main TH rows of the padded image: rows [t*TH, t*TH + TH)
                pl.BlockSpec((1, TH, Wp, Cin), lambda n, t: (n, t, 0, 0)),
                # 2-row halo just below: rows [t*TH + TH, t*TH + TH + 2)
                pl.BlockSpec((1, HALO, Wp, Cin),
                             lambda n, t: (n, (t + 1) * h_half, 0, 0)),
                pl.BlockSpec((KSIZE * KSIZE, Cin), lambda n, t: (0, 0)),
                pl.BlockSpec((Cin, Cout), lambda n, t: (0, 0)),
                pl.BlockSpec((1, Cout), lambda n, t: (0, 0)),
            ],
            out_specs=pl.BlockSpec((TH * W8, Cout),
                                   lambda n, t: (n * n_ht + t, 0)),
        ),
        compiler_params=pltpu.CompilerParams(
            dimension_semantics=("parallel", "parallel"),
            vmem_limit_bytes=int(vmem_cap)),
    )(x_pad, x_pad, dw_taps, pw_scaled, bias)

    out = out_flat.reshape(N, H_pad, W8, Cout)
    if H_pad != H or W8 != W:
        out = out[:, :H, :W, :]
    return out


def depthwise_separable_conv(x_nchw, dw_w, pw_w, gamma, beta, mean, var,
                             eps=1e-5, tile_h=None, compute_dtype=None,
                             out_dtype=jnp.bfloat16):
    """PyTorch-parity entry point: NCHW in, NCHW out (inference-mode BN)."""
    out_nhwc = depthwise_separable_conv_nhwc(
        jnp.transpose(x_nchw, (0, 2, 3, 1)), dw_w, pw_w, gamma, beta, mean,
        var, eps=eps, tile_h=tile_h, compute_dtype=compute_dtype,
        out_dtype=out_dtype)
    return jnp.transpose(out_nhwc, (0, 3, 1, 2))


def _reference(x_nchw, dw_w, pw_w, gamma, beta, mean, var, eps=1e-5):
    """Pure-JAX f32 reference (lax convs) for correctness checking."""
    Cin = x_nchw.shape[1]
    y = lax.conv_general_dilated(
        x_nchw, dw_w, window_strides=(1, 1), padding="SAME",
        dimension_numbers=("NCHW", "OIHW", "NCHW"),
        feature_group_count=Cin)
    y = lax.conv_general_dilated(
        y, pw_w, window_strides=(1, 1), padding="VALID",
        dimension_numbers=("NCHW", "OIHW", "NCHW"))
    inv = gamma / jnp.sqrt(var + eps)
    y = y * inv[None, :, None, None] + (beta - mean * inv)[None, :, None, None]
    return jnp.clip(y, 0.0, 6.0)


if __name__ == "__main__":
    key = jax.random.PRNGKey(0)
    k_x, k_dw, k_pw, k_g, k_b, k_m, k_v = jax.random.split(key, 7)

    N, Cin, Cout, H, W = 2, 4, 8, 16, 16

    x = jax.random.normal(k_x, (N, Cin, H, W), jnp.float32)
    dw_w = jax.random.normal(k_dw, (Cin, 1, KSIZE, KSIZE), jnp.float32) * 0.3
    pw_w = jax.random.normal(k_pw, (Cout, Cin, 1, 1), jnp.float32) * 0.3
    gamma = 1.0 + 0.1 * jax.random.normal(k_g, (Cout,), jnp.float32)
    beta = 0.1 * jax.random.normal(k_b, (Cout,), jnp.float32)
    mean = 0.1 * jax.random.normal(k_m, (Cout,), jnp.float32)
    var = jnp.abs(jax.random.normal(k_v, (Cout,), jnp.float32)) + 0.5

    # tile_h=8 -> 2 row strips per image, grid (2, 2): exercises the halo path.
    out = depthwise_separable_conv(x, dw_w, pw_w, gamma, beta, mean, var,
                                   tile_h=8)
    out = jax.block_until_ready(out)

    ref = _reference(x, dw_w, pw_w, gamma, beta, mean, var)
    assert out.shape == (N, Cout, H, W)
    # bf16 activations / bf16 depthwise+pointwise math vs. f32 reference:
    # relaxed tolerance.
    out_f32 = out.astype(jnp.float32)
    max_err = float(jnp.max(jnp.abs(out_f32 - ref)))
    assert jnp.allclose(out_f32, ref, atol=1e-1, rtol=1e-1), (
        f"mismatch vs reference, max abs err = {max_err}")

    print("KERNEL_OK")
</pallas_src>

<mosaic_0001>
module attributes {stable_mosaic.version = 11 : i64} {
  func.func @_dwsep_kernel(%arg0: i32, %arg1: i32, %arg2: memref<1x8x18x4xbf16, #tpu.memory_space<vmem>>, %arg3: memref<1x2x18x4xbf16, #tpu.memory_space<vmem>>, %arg4: memref<9x4xf32, #tpu.memory_space<vmem>>, %arg5: memref<4x8xbf16, #tpu.memory_space<vmem>>, %arg6: memref<1x8xf32, #tpu.memory_space<vmem>>, %arg7: memref<128x8xbf16, #tpu.memory_space<vmem>>) attributes {dimension_semantics = [#tpu.dimension_semantics<parallel>, #tpu.dimension_semantics<parallel>], iteration_bounds = array<i64: 2, 2>, scalar_prefetch = 0 : i64, scratch_operands = 0 : i64, tpu.core_type = #tpu.core_type<tc>, window_params = [{transform_indices = @transform_0, window_bounds = array<i64: 1, 8, 18, 4>}, {transform_indices = @transform_1, window_bounds = array<i64: 1, 2, 18, 4>}, {pipeline_mode = #tpu.pipeline_mode<synchronous>, transform_indices = @transform_2, window_bounds = array<i64: 9, 4>}, {pipeline_mode = #tpu.pipeline_mode<synchronous>, transform_indices = @transform_3, window_bounds = array<i64: 4, 8>}, {pipeline_mode = #tpu.pipeline_mode<synchronous>, transform_indices = @transform_4, window_bounds = array<i64: 1, 8>}, {transform_indices = @transform_5, window_bounds = array<i64: 128, 8>}]} {
    %c0 = arith.constant 0 : index
    %c0_0 = arith.constant 0 : index
    %0 = vector.load %arg4[%c0, %c0_0] : memref<9x4xf32, #tpu.memory_space<vmem>>, vector<9x4xf32>
    %c0_1 = arith.constant 0 : index
    %c0_2 = arith.constant 0 : index
    %1 = vector.load %arg5[%c0_1, %c0_2] : memref<4x8xbf16, #tpu.memory_space<vmem>>, vector<4x8xbf16>
    %c0_3 = arith.constant 0 : index
    %c0_4 = arith.constant 0 : index
    %2 = vector.load %arg6[%c0_3, %c0_4] : memref<1x8xf32, #tpu.memory_space<vmem>>, vector<1x8xf32>
    %c0_5 = arith.constant 0 : index
    %c0_6 = arith.constant 0 : index
    %c0_7 = arith.constant 0 : index
    %c0_8 = arith.constant 0 : index
    %3 = vector.load %arg2[%c0_5, %c0_6, %c0_7, %c0_8] : memref<1x8x18x4xbf16, #tpu.memory_space<vmem>>, vector<1x8x18x4xbf16>
    %4 = vector.shape_cast %3 : vector<1x8x18x4xbf16> to vector<8x18x4xbf16>
    %5 = arith.extf %4 : vector<8x18x4xbf16> to vector<8x18x4xf32>
    %c0_9 = arith.constant 0 : index
    %c0_10 = arith.constant 0 : index
    %c0_11 = arith.constant 0 : index
    %c0_12 = arith.constant 0 : index
    %6 = vector.load %arg3[%c0_9, %c0_10, %c0_11, %c0_12] : memref<1x2x18x4xbf16, #tpu.memory_space<vmem>>, vector<1x2x18x4xbf16>
    %7 = vector.shape_cast %6 : vector<1x2x18x4xbf16> to vector<2x18x4xbf16>
    %8 = arith.extf %7 : vector<2x18x4xbf16> to vector<2x18x4xf32>
    %9 = vector.extract_strided_slice %5 {offsets = [0, 0, 0], sizes = [8, 16, 4], strides = [1, 1, 1]} : vector<8x18x4xf32> to vector<8x16x4xf32>
    %10 = vector.extract_strided_slice %9 {offsets = [0, 0, 0], sizes = [6, 16, 4], strides = [1, 1, 1]} : vector<8x16x4xf32> to vector<6x16x4xf32>
    %11 = vector.extract_strided_slice %0 {offsets = [0, 0], sizes = [1, 4], strides = [1, 1]} : vector<9x4xf32> to vector<1x4xf32>
    %12 = vector.shape_cast %11 : vector<1x4xf32> to vector<4xf32>
    %13 = vector.shape_cast %12 : vector<4xf32> to vector<1x1x4xf32>
    %14 = vector.broadcast %13 : vector<1x1x4xf32> to vector<6x16x4xf32>
    %15 = arith.mulf %10, %14 : vector<6x16x4xf32>
    %16 = vector.extract_strided_slice %9 {offsets = [1, 0, 0], sizes = [6, 16, 4], strides = [1, 1, 1]} : vector<8x16x4xf32> to vector<6x16x4xf32>
    %17 = vector.extract_strided_slice %0 {offsets = [3, 0], sizes = [1, 4], strides = [1, 1]} : vector<9x4xf32> to vector<1x4xf32>
    %18 = vector.shape_cast %17 : vector<1x4xf32> to vector<4xf32>
    %19 = vector.shape_cast %18 : vector<4xf32> to vector<1x1x4xf32>
    %20 = vector.broadcast %19 : vector<1x1x4xf32> to vector<6x16x4xf32>
    %21 = arith.mulf %16, %20 : vector<6x16x4xf32>
    %22 = arith.addf %15, %21 : vector<6x16x4xf32>
    %23 = vector.extract_strided_slice %9 {offsets = [2, 0, 0], sizes = [6, 16, 4], strides = [1, 1, 1]} : vector<8x16x4xf32> to vector<6x16x4xf32>
    %24 = vector.extract_strided_slice %0 {offsets = [6, 0], sizes = [1, 4], strides = [1, 1]} : vector<9x4xf32> to vector<1x4xf32>
    %25 = vector.shape_cast %24 : vector<1x4xf32> to vector<4xf32>
    %26 = vector.shape_cast %25 : vector<4xf32> to vector<1x1x4xf32>
    %27 = vector.broadcast %26 : vector<1x1x4xf32> to vector<6x16x4xf32>
    %28 = arith.mulf %23, %27 : vector<6x16x4xf32>
    %29 = arith.addf %22, %28 : vector<6x16x4xf32>
    %30 = vector.extract_strided_slice %5 {offsets = [0, 1, 0], sizes = [8, 16, 4], strides = [1, 1, 1]} : vector<8x18x4xf32> to vector<8x16x4xf32>
    %31 = vector.extract_strided_slice %30 {offsets = [0, 0, 0], sizes = [6, 16, 4], strides = [1, 1, 1]} : vector<8x16x4xf32> to vector<6x16x4xf32>
    %32 = vector.extract_strided_slice %0 {offsets = [1, 0], sizes = [1, 4], strides = [1, 1]} : vector<9x4xf32> to vector<1x4xf32>
    %33 = vector.shape_cast %32 : vector<1x4xf32> to vector<4xf32>
    %34 = vector.shape_cast %33 : vector<4xf32> to vector<1x1x4xf32>
    %35 = vector.broadcast %34 : vector<1x1x4xf32> to vector<6x16x4xf32>
    %36 = arith.mulf %31, %35 : vector<6x16x4xf32>
    %37 = arith.addf %29, %36 : vector<6x16x4xf32>
    %38 = vector.extract_strided_slice %30 {offsets = [1, 0, 0], sizes = [6, 16, 4], strides = [1, 1, 1]} : vector<8x16x4xf32> to vector<6x16x4xf32>
    %39 = vector.extract_strided_slice %0 {offsets = [4, 0], sizes = [1, 4], strides = [1, 1]} : vector<9x4xf32> to vector<1x4xf32>
    %40 = vector.shape_cast %39 : vector<1x4xf32> to vector<4xf32>
    %41 = vector.shape_cast %40 : vector<4xf32> to vector<1x1x4xf32>
    %42 = vector.broadcast %41 : vector<1x1x4xf32> to vector<6x16x4xf32>
    %43 = arith.mulf %38, %42 : vector<6x16x4xf32>
    %44 = arith.addf %37, %43 : vector<6x16x4xf32>
    %45 = vector.extract_strided_slice %30 {offsets = [2, 0, 0], sizes = [6, 16, 4], strides = [1, 1, 1]} : vector<8x16x4xf32> to vector<6x16x4xf32>
    %46 = vector.extract_strided_slice %0 {offsets = [7, 0], sizes = [1, 4], strides = [1, 1]} : vector<9x4xf32> to vector<1x4xf32>
    %47 = vector.shape_cast %46 : vector<1x4xf32> to vector<4xf32>
    %48 = vector.shape_cast %47 : vector<4xf32> to vector<1x1x4xf32>
    %49 = vector.broadcast %48 : vector<1x1x4xf32> to vector<6x16x4xf32>
    %50 = arith.mulf %45, %49 : vector<6x16x4xf32>
    %51 = arith.addf %44, %50 : vector<6x16x4xf32>
    %52 = vector.extract_strided_slice %5 {offsets = [0, 2, 0], sizes = [8, 16, 4], strides = [1, 1, 1]} : vector<8x18x4xf32> to vector<8x16x4xf32>
    %53 = vector.extract_strided_slice %52 {offsets = [0, 0, 0], sizes = [6, 16, 4], strides = [1, 1, 1]} : vector<8x16x4xf32> to vector<6x16x4xf32>
    %54 = vector.extract_strided_slice %0 {offsets = [2, 0], sizes = [1, 4], strides = [1, 1]} : vector<9x4xf32> to vector<1x4xf32>
    %55 = vector.shape_cast %54 : vector<1x4xf32> to vector<4xf32>
    %56 = vector.shape_cast %55 : vector<4xf32> to vector<1x1x4xf32>
    %57 = vector.broadcast %56 : vector<1x1x4xf32> to vector<6x16x4xf32>
    %58 = arith.mulf %53, %57 : vector<6x16x4xf32>
    %59 = arith.addf %51, %58 : vector<6x16x4xf32>
    %60 = vector.extract_strided_slice %52 {offsets = [1, 0, 0], sizes = [6, 16, 4], strides = [1, 1, 1]} : vector<8x16x4xf32> to vector<6x16x4xf32>
    %61 = vector.extract_strided_slice %0 {offsets = [5, 0], sizes = [1, 4], strides = [1, 1]} : vector<9x4xf32> to vector<1x4xf32>
    %62 = vector.shape_cast %61 : vector<1x4xf32> to vector<4xf32>
    %63 = vector.shape_cast %62 : vector<4xf32> to vector<1x1x4xf32>
    %64 = vector.broadcast %63 : vector<1x1x4xf32> to vector<6x16x4xf32>
    %65 = arith.mulf %60, %64 : vector<6x16x4xf32>
    %66 = arith.addf %59, %65 : vector<6x16x4xf32>
    %67 = vector.extract_strided_slice %52 {offsets = [2, 0, 0], sizes = [6, 16, 4], strides = [1, 1, 1]} : vector<8x16x4xf32> to vector<6x16x4xf32>
    %68 = vector.extract_strided_slice %0 {offsets = [8, 0], sizes = [1, 4], strides = [1, 1]} : vector<9x4xf32> to vector<1x4xf32>
    %69 = vector.shape_cast %68 : vector<1x4xf32> to vector<4xf32>
    %70 = vector.shape_cast %69 : vector<4xf32> to vector<1x1x4xf32>
    %71 = vector.broadcast %70 : vector<1x1x4xf32> to vector<6x16x4xf32>
    %72 = arith.mulf %67, %71 : vector<6x16x4xf32>
    %73 = arith.addf %66, %72 : vector<6x16x4xf32>
    %74 = vector.shape_cast %73 : vector<6x16x4xf32> to vector<96x4xf32>
    %75 = arith.truncf %74 : vector<96x4xf32> to vector<96x4xbf16>
    %cst = arith.constant dense<0.000000e+00> : vector<96x8xf32>
    %76 = tpu.matmul %75, %1, %cst {dimension_numbers = #tpu.dot_dimension_numbers<[1], [0], [0], [1], [0, 0, 1, 1], [], []>} : vector<96x4xbf16>, vector<4x8xbf16>, vector<96x8xf32> -> vector<96x8xf32>
    %77 = vector.broadcast %2 : vector<1x8xf32> to vector<96x8xf32>
    %78 = arith.addf %76, %77 : vector<96x8xf32>
    %cst_13 = arith.constant 0.000000e+00 : f32
    %cst_14 = arith.constant 6.000000e+00 : f32
    %79 = vector.broadcast %cst_13 : f32 to vector<96x8xf32>
    %80 = arith.maximumf %79, %78 : vector<96x8xf32>
    %81 = vector.broadcast %cst_14 : f32 to vector<96x8xf32>
    %82 = arith.minimumf %81, %80 : vector<96x8xf32>
    %83 = arith.truncf %82 : vector<96x8xf32> to vector<96x8xbf16>
    %c0_15 = arith.constant 0 : index
    %c0_16 = arith.constant 0 : index
    %84 = vector.load %arg7[%c0_15, %c0_16] : memref<128x8xbf16, #tpu.memory_space<vmem>>, vector<96x8xbf16>
    tpu.vector_store %arg7[%c0_15, %c0_16], %83 {strides = array<i32>} : memref<128x8xbf16, #tpu.memory_space<vmem>>, vector<96x8xbf16>,
    %85 = vector.extract_strided_slice %5 {offsets = [6, 0, 0], sizes = [2, 18, 4], strides = [1, 1, 1]} : vector<8x18x4xf32> to vector<2x18x4xf32>
    %86 = tpu.concatenate %85, %8 in 0 : vector<2x18x4xf32>, vector<2x18x4xf32> -> vector<4x18x4xf32>
    %87 = vector.extract_strided_slice %86 {offsets = [0, 0, 0], sizes = [4, 16, 4], strides = [1, 1, 1]} : vector<4x18x4xf32> to vector<4x16x4xf32>
    %88 = vector.extract_strided_slice %87 {offsets = [0, 0, 0], sizes = [2, 16, 4], strides = [1, 1, 1]} : vector<4x16x4xf32> to vector<2x16x4xf32>
    %89 = vector.extract_strided_slice %0 {offsets = [0, 0], sizes = [1, 4], strides = [1, 1]} : vector<9x4xf32> to vector<1x4xf32>
    %90 = vector.shape_cast %89 : vector<1x4xf32> to vector<4xf32>
    %91 = vector.shape_cast %90 : vector<4xf32> to vector<1x1x4xf32>
    %92 = vector.broadcast %91 : vector<1x1x4xf32> to vector<2x16x4xf32>
    %93 = arith.mulf %88, %92 : vector<2x16x4xf32>
    %94 = vector.extract_strided_slice %87 {offsets = [1, 0, 0], sizes = [2, 16, 4], strides = [1, 1, 1]} : vector<4x16x4xf32> to vector<2x16x4xf32>
    %95 = vector.extract_strided_slice %0 {offsets = [3, 0], sizes = [1, 4], strides = [1, 1]} : vector<9x4xf32> to vector<1x4xf32>
    %96 = vector.shape_cast %95 : vector<1x4xf32> to vector<4xf32>
    %97 = vector.shape_cast %96 : vector<4xf32> to vector<1x1x4xf32>
    %98 = vector.broadcast %97 : vector<1x1x4xf32> to vector<2x16x4xf32>
    %99 = arith.mulf %94, %98 : vector<2x16x4xf32>
    %100 = arith.addf %93, %99 : vector<2x16x4xf32>
    %101 = vector.extract_strided_slice %87 {offsets = [2, 0, 0], sizes = [2, 16, 4], strides = [1, 1, 1]} : vector<4x16x4xf32> to vector<2x16x4xf32>
    %102 = vector.extract_strided_slice %0 {offsets = [6, 0], sizes = [1, 4], strides = [1, 1]} : vector<9x4xf32> to vector<1x4xf32>
    %103 = vector.shape_cast %102 : vector<1x4xf32> to vector<4xf32>
    %104 = vector.shape_cast %103 : vector<4xf32> to vector<1x1x4xf32>
    %105 = vector.broadcast %104 : vector<1x1x4xf32> to vector<2x16x4xf32>
    %106 = arith.mulf %101, %105 : vector<2x16x4xf32>
    %107 = arith.addf %100, %106 : vector<2x16x4xf32>
    %108 = vector.extract_strided_slice %86 {offsets = [0, 1, 0], sizes = [4, 16, 4], strides = [1, 1, 1]} : vector<4x18x4xf32> to vector<4x16x4xf32>
    %109 = vector.extract_strided_slice %108 {offsets = [0, 0, 0], sizes = [2, 16, 4], strides = [1, 1, 1]} : vector<4x16x4xf32> to vector<2x16x4xf32>
    %110 = vector.extract_strided_slice %0 {offsets = [1, 0], sizes = [1, 4], strides = [1, 1]} : vector<9x4xf32> to vector<1x4xf32>
    %111 = vector.shape_cast %110 : vector<1x4xf32> to vector<4xf32>
    %112 = vector.shape_cast %111 : vector<4xf32> to vector<1x1x4xf32>
    %113 = vector.broadcast %112 : vector<1x1x4xf32> to vector<2x16x4xf32>
    %114 = arith.mulf %109, %113 : vector<2x16x4xf32>
    %115 = arith.addf %107, %114 : vector<2x16x4xf32>
    %116 = vector.extract_strided_slice %108 {offsets = [1, 0, 0], sizes = [2, 16, 4], strides = [1, 1, 1]} : vector<4x16x4xf32> to vector<2x16x4xf32>
    %117 = vector.extract_strided_slice %0 {offsets = [4, 0], sizes = [1, 4], strides = [1, 1]} : vector<9x4xf32> to vector<1x4xf32>
    %118 = vector.shape_cast %117 : vector<1x4xf32> to vector<4xf32>
    %119 = vector.shape_cast %118 : vector<4xf32> to vector<1x1x4xf32>
    %120 = vector.broadcast %119 : vector<1x1x4xf32> to vector<2x16x4xf32>
    %121 = arith.mulf %116, %120 : vector<2x16x4xf32>
    %122 = arith.addf %115, %121 : vector<2x16x4xf32>
    %123 = vector.extract_strided_slice %108 {offsets = [2, 0, 0], sizes = [2, 16, 4], strides = [1, 1, 1]} : vector<4x16x4xf32> to vector<2x16x4xf32>
    %124 = vector.extract_strided_slice %0 {offsets = [7, 0], sizes = [1, 4], strides = [1, 1]} : vector<9x4xf32> to vector<1x4xf32>
    %125 = vector.shape_cast %124 : vector<1x4xf32> to vector<4xf32>
    %126 = vector.shape_cast %125 : vector<4xf32> to vector<1x1x4xf32>
    %127 = vector.broadcast %126 : vector<1x1x4xf32> to vector<2x16x4xf32>
    %128 = arith.mulf %123, %127 : vector<2x16x4xf32>
    %129 = arith.addf %122, %128 : vector<2x16x4xf32>
    %130 = vector.extract_strided_slice %86 {offsets = [0, 2, 0], sizes = [4, 16, 4], strides = [1, 1, 1]} : vector<4x18x4xf32> to vector<4x16x4xf32>
    %131 = vector.extract_strided_slice %130 {offsets = [0, 0, 0], sizes = [2, 16, 4], strides = [1, 1, 1]} : vector<4x16x4xf32> to vector<2x16x4xf32>
    %132 = vector.extract_strided_slice %0 {offsets = [2, 0], sizes = [1, 4], strides = [1, 1]} : vector<9x4xf32> to vector<1x4xf32>
    %133 = vector.shape_cast %132 : vector<1x4xf32> to vector<4xf32>
    %134 = vector.shape_cast %133 : vector<4xf32> to vector<1x1x4xf32>
    %135 = vector.broadcast %134 : vector<1x1x4xf32> to vector<2x16x4xf32>
    %136 = arith.mulf %131, %135 : vector<2x16x4xf32>
    %137 = arith.addf %129, %136 : vector<2x16x4xf32>
    %138 = vector.extract_strided_slice %130 {offsets = [1, 0, 0], sizes = [2, 16, 4], strides = [1, 1, 1]} : vector<4x16x4xf32> to vector<2x16x4xf32>
    %139 = vector.extract_strided_slice %0 {offsets = [5, 0], sizes = [1, 4], strides = [1, 1]} : vector<9x4xf32> to vector<1x4xf32>
    %140 = vector.shape_cast %139 : vector<1x4xf32> to vector<4xf32>
    %141 = vector.shape_cast %140 : vector<4xf32> to vector<1x1x4xf32>
    %142 = vector.broadcast %141 : vector<1x1x4xf32> to vector<2x16x4xf32>
    %143 = arith.mulf %138, %142 : vector<2x16x4xf32>
    %144 = arith.addf %137, %143 : vector<2x16x4xf32>
    %145 = vector.extract_strided_slice %130 {offsets = [2, 0, 0], sizes = [2, 16, 4], strides = [1, 1, 1]} : vector<4x16x4xf32> to vector<2x16x4xf32>
    %146 = vector.extract_strided_slice %0 {offsets = [8, 0], sizes = [1, 4], strides = [1, 1]} : vector<9x4xf32> to vector<1x4xf32>
    %147 = vector.shape_cast %146 : vector<1x4xf32> to vector<4xf32>
    %148 = vector.shape_cast %147 : vector<4xf32> to vector<1x1x4xf32>
    %149 = vector.broadcast %148 : vector<1x1x4xf32> to vector<2x16x4xf32>
    %150 = arith.mulf %145, %149 : vector<2x16x4xf32>
    %151 = arith.addf %144, %150 : vector<2x16x4xf32>
    %152 = vector.shape_cast %151 : vector<2x16x4xf32> to vector<32x4xf32>
    %153 = arith.truncf %152 : vector<32x4xf32> to vector<32x4xbf16>
    %cst_17 = arith.constant dense<0.000000e+00> : vector<32x8xf32>
    %154 = tpu.matmul %153, %1, %cst_17 {dimension_numbers = #tpu.dot_dimension_numbers<[1], [0], [0], [1], [0, 0, 1, 1], [], []>} : vector<32x4xbf16>, vector<4x8xbf16>, vector<32x8xf32> -> vector<32x8xf32>
    %155 = vector.broadcast %2 : vector<1x8xf32> to vector<32x8xf32>
    %156 = arith.addf %154, %155 : vector<32x8xf32>
    %cst_18 = arith.constant 0.000000e+00 : f32
    %cst_19 = arith.constant 6.000000e+00 : f32
    %157 = vector.broadcast %cst_18 : f32 to vector<32x8xf32>
    %158 = arith.maximumf %157, %156 : vector<32x8xf32>
    %159 = vector.broadcast %cst_19 : f32 to vector<32x8xf32>
    %160 = arith.minimumf %159, %158 : vector<32x8xf32>
    %161 = arith.truncf %160 : vector<32x8xf32> to vector<32x8xbf16>
    %c96 = arith.constant 96 : index
    %c0_20 = arith.constant 0 : index
    %162 = vector.load %arg7[%c96, %c0_20] : memref<128x8xbf16, #tpu.memory_space<vmem>>, vector<32x8xbf16>
    tpu.vector_store %arg7[%c96, %c0_20], %161 {strides = array<i32>} : memref<128x8xbf16, #tpu.memory_space<vmem>>, vector<32x8xbf16>,
    return
  }
  func.func @transform_0(%arg0: i32, %arg1: i32) -> (i32, i32, i32, i32) {
    %c0_i32 = arith.constant 0 : i32
    %c0_i32_0 = arith.constant 0 : i32
    %c0_i32_1 = arith.constant 0 : i32
    return %arg0, %arg1, %c0_i32, %c0_i32_0 : i32, i32, i32, i32
  }
  func.func @transform_1(%arg0: i32, %arg1: i32) -> (i32, i32, i32, i32) {
    %c1_i32 = arith.constant 1 : i32
    %0 = arith.addi %arg1, %c1_i32 : i32
    %c4_i32 = arith.constant 4 : i32
    %1 = arith.muli %0, %c4_i32 : i32
    %c0_i32 = arith.constant 0 : i32
    %c0_i32_0 = arith.constant 0 : i32
    %c0_i32_1 = arith.constant 0 : i32
    return %arg0, %1, %c0_i32, %c0_i32_0 : i32, i32, i32, i32
  }
  func.func @transform_2(%arg0: i32, %arg1: i32) -> (i32, i32) {
    %c0_i32 = arith.constant 0 : i32
    %c0_i32_0 = arith.constant 0 : i32
    %c0_i32_1 = arith.constant 0 : i32
    return %c0_i32, %c0_i32_0 : i32, i32
  }
  func.func @transform_3(%arg0: i32, %arg1: i32) -> (i32, i32) {
    %c0_i32 = arith.constant 0 : i32
    %c0_i32_0 = arith.constant 0 : i32
    %c0_i32_1 = arith.constant 0 : i32
    return %c0_i32, %c0_i32_0 : i32, i32
  }
  func.func @transform_4(%arg0: i32, %arg1: i32) -> (i32, i32) {
    %c0_i32 = arith.constant 0 : i32
    %c0_i32_0 = arith.constant 0 : i32
    %c0_i32_1 = arith.constant 0 : i32
    return %c0_i32, %c0_i32_0 : i32, i32
  }
  func.func @transform_5(%arg0: i32, %arg1: i32) -> (i32, i32) {
    %c2_i32 = arith.constant 2 : i32
    %0 = arith.muli %arg0, %c2_i32 : i32
    %1 = arith.addi %0, %arg1 : i32
    %c0_i32 = arith.constant 0 : i32
    %c0_i32_0 = arith.constant 0 : i32
    return %1, %c0_i32 : i32, i32
  }
}

</mosaic_0001>

<bundles_post_ra>
// kernel: tpu_custom_call.1
= control target key start
LH: loop header
LB: loop body
LE: loop exit
PB: predicated region body
PF: predicated region fallthrough
CT: control target
= control target key end

     0   :  { %s1880_s18 = smov 0   ;;  %s1882_s19 = smov 0   ;;  %s2612_s0 = inlined_call_operand.vmem [shape: bf16[2,18,18,4], index: 0, kind: input, shape index: {}]   ;;  %s2613_s1 = inlined_call_operand.vmem [shape: bf16[2,18,18,4], index: 1, kind: input, shape index: {}]   ;;  %s2614_s2 = inlined_call_operand.vmem [shape: f32[9,4], index: 2, kind: input, shape index: {}]   ;;  %s2615_s3 = inlined_call_operand.vmem [shape: bf16[4,8], index: 3, kind: input, shape index: {}]   ;;  %s2616_s4 = inlined_call_operand.vmem [shape: f32[1,8], index: 4, kind: input, shape index: {}]   ;;  %s2617_s5 = inlined_call_operand.vmem [shape: bf16[512,8], index: 5, kind: output, shape index: {}]  }
   0x1   :  { %s1884_s20 = smov 0   ;;  %s1886_s21 = smov 0  }
   0x2   :  { %s1888_s22 = smov 0  }
   0x3 LB: > { %s24_s23 = sadd.s32 1, %s1840_s20  ;;  %s27_s24 = sadd.s32 1, %s1844_s21  ;;  %s1848_s22 = sphi %s1888_s22, %s15_s22   ;;  %s1844_s21 = sphi %s1886_s21, %s2622_s21   ;;  %s1840_s20 = sphi %s1884_s20, %s2621_s20   ;;  %s1836_s19 = sphi %s1882_s19, %s2620_s19   ;;  %s1832_s18 = sphi %s1880_s18, %s2619_s18  }
   0x4   : > { %p25_p0 = scmp.ge.s32.totalorder %s24_s23, 2  ;;  %p1646_p1 = scmp.ge.s32.totalorder %s1848_s22, 1 }
   0x5   : > { %p247_p2 = scmp.lt.s32.totalorder %s1848_s22, 5 }
   0x6   : > { %s2624_s23 = smov (%p25_p0, %s24_s23), 0  ;;  %s2626_s24 = smov (!%p25_p0, %s27_s24), %s1844_s21 }
   0x7   : > { %p248_p3 = pnand %p1646_p1, %p247_p2  ;;  %p29_p4 = scmp.ge.s32.totalorder %s2626_s24, 2 }
   0x8   : > { %v348_v0 = vld [vmem:[%s2615_s3] sm:$0x3] (!%p248_p3)  ;;  %vm1079_vm0 = vcmask (!%p248_p3), 1041408   ;;  %s1918_s27 = sshll.u32 (!%p248_p3), %s1832_s18, 3  ;;  %p305_p5 = scmp.lt.s32.totalorder (!%p248_p3), %s1836_s19, 1  ;;  %v410_v1 = vlaneseq (!%p248_p3)  ;;  %vm522_vm1 = vcmask (!%p248_p3), 1046528  }
   0x9   : > { %s2628_s24 = smov (%p29_p4, %s2626_s24), 0  ;;  %251 = sbr.rel (%p248_p3) target bundleno = 404 (0x194), region = 40 }
   0xa   : > { %1764 = vmatprep.subr.msk.bf16.mxu1 (!%p248_p3), %vm1079_vm0, %v348_v0  ;;  %1763 = vmatprep.subr.msk.bf16.mxu0 (!%p248_p3), %vm1079_vm0, %v348_v0  ;;  %v1921_v2 = vsel (!%p248_p3), %vm1079_vm0, %v348_v0, 0  ;;  %p307_p6 = scmp.lt.s32.totalorder (!%p248_p3), %s1918_s27, 17  ;;  %v411_v3 = vshrl.u32 (!%p248_p3), %v410_v1, 7  ;;  %s1727_s6 = sadd.s32 (!%p248_p3), 8, %s1918_s27  ;;  %v346_v8 = vld [vmem:[%s2614_s2] sm:$0xff] (!%p248_p3)  ;;  %vm805_vm2 = vcmask (!%p248_p3), 1045504  }
   0xb   : > { %1762 = vmatpush3.bf16.msra.mxu1 (!%p248_p3), %v1921_v2  ;;  %1742 = vmatpush3.bf16.msra.mxu0 (!%p248_p3), %v1921_v2  ;;  %p1935_p7 = scmp.lt.s32.totalorder (!%p248_p3), %s1727_s6, 17  ;;  %vm1060_vm3 = vcmask (!%p248_p3), 31744   ;;  %s1652_s8 = sshll.u32 (!%p248_p3), %s1836_s19, 1  ;;  %vm1236_vm4 = vcmask (!%p248_p3), 60416  }
   0xc   : > { %1765 = vmatprep.subr.msk.bf16.mxu1 (!%p248_p3), %vm1079_vm0, %v348_v0  ;;  %v412_v4 = vsub.s32 (!%p248_p3), 0, %v411_v3  ;;  %v428_v5 = vsub.s32 (!%p248_p3), 3, %v411_v3  ;;  %v456_v6 = vsub.s32 (!%p248_p3), 6, %v411_v3  ;;  %v484_v7 = vsub.s32 (!%p248_p3), 1, %v411_v3  ;;  %s336_s9 = sadd.s32 (!%p248_p3), %s1832_s18, %s1652_s8 }
   0xd   : > { %v579_v9 = vsub.s32 (!%p248_p3), 4, %v411_v3  ;;  %v673_v10 = vsub.s32 (!%p248_p3), 7, %v411_v3  ;;  %v767_v11 = vsub.s32 (!%p248_p3), 2, %v411_v3  ;;  %v862_v12 = vsub.s32 (!%p248_p3), 5, %v411_v3  ;;  %s1653_s10 = sshll.u32 (!%p248_p3), %s336_s9, 4 }
   0xe   : > { %v1946_v13 = vrot.slane (!%p248_p3), %v346_v8, %v412_v4  ;;  %v1948_v14 = vrot.slane (!%p248_p3), %v346_v8, %v428_v5  ;;  %v1950_v15 = vrot.slane (!%p248_p3), %v346_v8, %v456_v6  ;;  %v1952_v16 = vrot.slane (!%p248_p3), %v346_v8, %v484_v7  ;;  %p338_p8 = scmp.lt.s32.totalorder (!%p248_p3), %s1653_s10, 63 }
   0xf   : > { %v1957_v20 = vrot.slane (!%p248_p3), %v346_v8, %v579_v9  ;;  %v1959_v21 = vrot.slane (!%p248_p3), %v346_v8, %v673_v10  ;;  %v1961_v22 = vrot.slane (!%p248_p3), %v346_v8, %v767_v11  ;;  %v1963_v23 = vrot.slane (!%p248_p3), %v346_v8, %v862_v12  ;;  %v2019_v8 = vld [vmem:[%s2614_s2 + $0x8] ss:$0 sm:$0xff] (!%p248_p3) }
  0x10   : > { %s1927_s28 = scalar_select %p305_p5, %s1836_s19, 1 }
  0x11   : > { %s308_s29 = scalar_select %p307_p6, %s1918_s27, 17 }
  0x12   : > { %s1767_s30 = smul.u32 54, %s1927_s28  ;;  %s2630_s6 = smov (!%p1935_p7, %s1727_s6), 17 }
  0x13   : > { %s1766_s7 = smul.u32 3, %s308_s29  ;;  %s2632_s10 = smov (!%p338_p8, %s1653_s10), 63 }
  0x14   : > { %s1768_s16 = smul.u32 3, %s2630_s6  ;;  %s1654_s13 = sshll.u32 %s2632_s10, 2 }
  0x15   : > { %s311_s11 = sadd.s32 %s1767_s30, %s1766_s7  ;;  %s2551_s14 = scalar_lea.vmem %s2617_s5, %s1654_s13 }
  0x16   : > { %s1648_s12 = sshll.u32 %s311_s11, 2  ;;  %s1995_s17 = sadd.s32 %s1768_s16, %s1767_s30 }
  0x17   : > { %s1944_s15 = scalar_lea.vmem %s2612_s0, %s1648_s12  ;;  %s1651_s27 = sshll.u32 %s1995_s17, 2 }
  0x18   : > { %v1707_v17 = vld [vmem:[%s1944_s15] sm:$0xff]   ;;  %v352_v18 = vld [vmem:[%s1944_s15 + $0x8] sm:$0x1]  ;;  %v353_v19 = vld [vmem:[%s1944_s15 + $0xc] sm:$0xff]   ;;  %s2313_s30 = scalar_lea.vmem %s2613_s1, %s1651_s27 }
  0x19   : > { %v1708_v24 = vunpack.c.l.bf16 %v1707_v17  ;;  %v1709_v25 = vunpack.c.h.bf16 %v1707_v17  ;;  %v355_v26 = vld [vmem:[%s1944_s15 + $0x14] sm:$0x1]  ;;  %v1728_v27 = vld [vmem:[%s1944_s15 + $0x18] sm:$0xff]   ;;  %v358_v28 = vld [vmem:[%s1944_s15 + $0x20] sm:$0x1]  ;;  %v376_v29 = vunpack.c.l.bf16 %v352_v18  ;;  %v1970_v30 = vunpack.c.l.bf16 %v353_v19 }
  0x1a   : > { %v1972_v31 = vunpack.c.l.bf16 %v1728_v27  ;;  %v1974_v32 = vunpack.c.h.bf16 %v1728_v27  ;;  %v1976_v33 = vunpack.c.h.bf16 %v353_v19  ;;  %v1978_v34 = vunpack.c.l.bf16 %v355_v26 }
  0x1b   : > { %v1980_v35 = vunpack.c.l.bf16 %v358_v28  ;;  %v414_v36 = vmul.f32 %v1708_v24, %v1946_v13  ;;  %v415_v37 = vmul.f32 %v1709_v25, %v1946_v13  ;;  %v430_v38 = vmul.f32 %v1948_v14, %v1970_v30 }
  0x1c   : > { %v431_v39 = vmul.f32 %v1948_v14, %v1976_v33  ;;  %v458_v40 = vmul.f32 %v1972_v31, %v1950_v15  ;;  %v459_v41 = vmul.f32 %v1974_v32, %v1950_v15  ;;  %v486_v42 = vmul.f32 %v1708_v24, %v1952_v16 }
  0x1d   : > { %v442_v43 = vadd.f32 %v430_v38, %v414_v36  ;;  %v487_v44 = vmul.f32 %v1709_v25, %v1952_v16  ;;  %v488_v45 = vmul.f32 %v1952_v16, %v376_v29  ;;  %v581_v46 = vmul.f32 %v1957_v20, %v1970_v30 }
  0x1e   : > { %v443_v47 = vadd.f32 %v431_v39, %v415_v37  ;;  %v523_v48 = vrot.slane %v486_v42, 1  ;;  %v582_v49 = vmul.f32 %v1957_v20, %v1976_v33  ;;  %v583_v50 = vmul.f32 %v1957_v20, %v1978_v34  ;;  %v1729_v39 = vld [vmem:[%s1944_s15 + $0x30] sm:$0xff]  }
  0x1f   : > { %v470_v51 = vadd.f32 %v458_v40, %v442_v43  ;;  %v524_v52 = vrot.slane %v487_v44, 1  ;;  %v526_v53 = vrot.slane %v488_v45, 1  ;;  %v617_v54 = vrot.slane %v581_v46, 1  ;;  %v1730_v44 = vld [vmem:[%s1944_s15 + $0x48] sm:$0xff]  }
  0x20   : > { %v471_v55 = vadd.f32 %v459_v41, %v443_v47  ;;  %v618_v56 = vrot.slane %v582_v49, 1  ;;  %v620_v57 = vrot.slane %v583_v50, 1  ;;  %v675_v58 = vmul.f32 %v1972_v31, %v1959_v21 }
  0x21   : > { %v525_v59 = vsel %vm522_vm1, %v523_v48, %v524_v52  ;;  %v527_v60 = vsel %vm522_vm1, %v524_v52, %v526_v53  ;;  %v676_v61 = vmul.f32 %v1974_v32, %v1959_v21  ;;  %v677_v62 = vmul.f32 %v1959_v21, %v1980_v35  ;;  %v364_v53 = vld [vmem:[%s1944_s15 + $0x38] sm:$0x1] }
  0x22   : > { %v565_v63 = vadd.f32 %v525_v59, %v470_v51  ;;  %v566_v0 = vadd.f32 %v527_v60, %v471_v55  ;;  %v619_v1 = vsel %vm522_vm1, %v617_v54, %v618_v56  ;;  %v621_v3 = vsel %vm522_vm1, %v618_v56, %v620_v57  ;;  %v365_v54 = vld [vmem:[%s1944_s15 + $0x3c] sm:$0xff]   ;;  %v370_v60 = vld [vmem:[%s1944_s15 + $0x50] sm:$0x1] }
  0x23   : > { %v711_v4 = vrot.slane %v675_v58, 1  ;;  %v712_v5 = vrot.slane %v676_v61, 1  ;;  %v714_v6 = vrot.slane %v677_v62, 1  ;;  %v769_v7 = vmul.f32 %v1708_v24, %v1961_v22  ;;  %v367_v58 = vld [vmem:[%s1944_s15 + $0x44] sm:$0x1] }
  0x24   : > { %v659_v9 = vadd.f32 %v619_v1, %v565_v63  ;;  %v660_v10 = vadd.f32 %v621_v3, %v566_v0  ;;  %v770_v11 = vmul.f32 %v1709_v25, %v1961_v22  ;;  %v771_v12 = vmul.f32 %v1961_v22, %v376_v29 }
  0x25   : > { %v713_v17 = vsel %vm522_vm1, %v711_v4, %v712_v5  ;;  %v715_v18 = vsel %vm522_vm1, %v712_v5, %v714_v6  ;;  %v806_v19 = vrot.slane %v769_v7, 2  ;;  %v864_v24 = vmul.f32 %v1963_v23, %v1970_v30 }
  0x26   : > { %v753_v26 = vadd.f32 %v713_v17, %v659_v9  ;;  %v754_v27 = vadd.f32 %v715_v18, %v660_v10  ;;  %v807_v28 = vrot.slane %v770_v11, 2  ;;  %v809_v36 = vrot.slane %v771_v12, 2 }
  0x27   : > { %v865_v37 = vmul.f32 %v1963_v23, %v1976_v33  ;;  %v866_v25 = vmul.f32 %v1963_v23, %v1978_v34  ;;  %v900_v29 = vrot.slane %v864_v24, 2  ;;  %v958_v38 = vmul.f32 %v1972_v31, %v2019_v8 }
  0x28   : > { %v808_v40 = vsel %vm805_vm2, %v806_v19, %v807_v28  ;;  %v810_v41 = vsel %vm805_vm2, %v807_v28, %v809_v36  ;;  %v959_v42 = vmul.f32 %v1974_v32, %v2019_v8  ;;  %v960_v43 = vmul.f32 %v2019_v8, %v1980_v35 }
  0x29   : > { %v848_v45 = vadd.f32 %v808_v40, %v753_v26  ;;  %v849_v46 = vadd.f32 %v810_v41, %v754_v27  ;;  %v901_v47 = vrot.slane %v865_v37, 2  ;;  %v903_v48 = vrot.slane %v866_v25, 2 }
  0x2a   : > { %v994_v49 = vrot.slane %v958_v38, 2  ;;  %v995_v50 = vrot.slane %v959_v42, 2  ;;  %v997_v51 = vrot.slane %v960_v43, 2  ;;  %v2041_v52 = vunpack.c.l.bf16 %v1729_v39 }
  0x2b   : > { %v902_v55 = vsel %vm805_vm2, %v900_v29, %v901_v47  ;;  %v904_v56 = vsel %vm805_vm2, %v901_v47, %v903_v48  ;;  %v2047_v57 = vunpack.c.h.bf16 %v1729_v39  ;;  %v2050_v59 = vunpack.c.l.bf16 %v1730_v44 }
  0x2c   : > { %v942_v61 = vadd.f32 %v902_v55, %v848_v45  ;;  %v943_v62 = vadd.f32 %v904_v56, %v849_v46  ;;  %v996_v63 = vsel %vm805_vm2, %v994_v49, %v995_v50  ;;  %v998_v0 = vsel %vm805_vm2, %v995_v50, %v997_v51 }
  0x2d   : > { %v2055_v1 = vunpack.c.h.bf16 %v1730_v44  ;;  %v2057_v3 = vunpack.c.l.bf16 %v364_v53  ;;  %v2059_v4 = vunpack.c.l.bf16 %v365_v54  ;;  %v2061_v5 = vunpack.c.h.bf16 %v365_v54 }
  0x2e   : > { %v1036_v6 = vadd.f32 %v996_v63, %v942_v61  ;;  %v1037_v7 = vadd.f32 %v998_v0, %v943_v62  ;;  %v2063_v9 = vunpack.c.l.bf16 %v367_v58  ;;  %v2065_v10 = vunpack.c.l.bf16 %v370_v60 }
  0x2f   : > { %v422_v11 = vmul.f32 %v2041_v52, %v1946_v13  ;;  %v423_v12 = vmul.f32 %v2047_v57, %v1946_v13  ;;  %v438_v17 = vmul.f32 %v1948_v14, %v2059_v4  ;;  %v439_v18 = vmul.f32 %v1948_v14, %v2061_v5 }
  0x30   : > { %v1048_v19 = vpack.c.bf16 %v1037_v7, %v1036_v6  ;;  %v466_v24 = vmul.f32 %v2050_v59, %v1950_v15  ;;  %v467_v26 = vmul.f32 %v2055_v1, %v1950_v15  ;;  %v498_v27 = vmul.f32 %v2041_v52, %v1952_v16 }
  0x31   : > { %v450_v28 = vadd.f32 %v438_v17, %v422_v11  ;;  %v451_v36 = vadd.f32 %v439_v18, %v423_v12  ;;  %v499_v37 = vmul.f32 %v2047_v57, %v1952_v16  ;;  %v500_v25 = vmul.f32 %v1952_v16, %v2057_v3 }
  0x32   : > { %1743 = vmatprep.mubr.msk.bf16.mxu0 %vm1060_vm3, %v1048_v19  ;;  %v543_v29 = vrot.slane %v498_v27, 1  ;;  %v593_v38 = vmul.f32 %v1957_v20, %v2059_v4  ;;  %v594_v39 = vmul.f32 %v1957_v20, %v2061_v5  ;;  %v595_v40 = vmul.f32 %v1957_v20, %v2063_v9 }
  0x33   : > { %v478_v41 = vadd.f32 %v466_v24, %v450_v28  ;;  %v479_v42 = vadd.f32 %v467_v26, %v451_v36  ;;  %v544_v43 = vrot.slane %v499_v37, 1  ;;  %v546_v44 = vrot.slane %v500_v25, 1 }
  0x34   : > { %v637_v45 = vrot.slane %v593_v38, 1  ;;  %v638_v46 = vrot.slane %v594_v39, 1  ;;  %v640_v47 = vrot.slane %v595_v40, 1  ;;  %v687_v48 = vmul.f32 %v2050_v59, %v1959_v21  ;;  %v359_v38 = vld [vmem:[%s1944_s15 + $0x24] sm:$0xff]  }
  0x35   : > { %v545_v49 = vsel %vm522_vm1, %v543_v29, %v544_v43  ;;  %v547_v50 = vsel %vm522_vm1, %v544_v43, %v546_v44  ;;  %v688_v51 = vmul.f32 %v2055_v1, %v1959_v21  ;;  %v689_v53 = vmul.f32 %v1959_v21, %v2065_v10  ;;  %v361_v43 = vld [vmem:[%s1944_s15 + $0x2c] sm:$0x1] }
  0x36   : > { %v573_v54 = vadd.f32 %v545_v49, %v478_v41  ;;  %v574_v55 = vadd.f32 %v547_v50, %v479_v42  ;;  %v639_v56 = vsel %vm522_vm1, %v637_v45, %v638_v46  ;;  %v641_v58 = vsel %vm522_vm1, %v638_v46, %v640_v47 }
  0x37   : > { %v731_v60 = vrot.slane %v687_v48, 1  ;;  %v732_v61 = vrot.slane %v688_v51, 1  ;;  %v734_v62 = vrot.slane %v689_v53, 1  ;;  %v781_v63 = vmul.f32 %v2041_v52, %v1961_v22 }
  0x38   : > { %v667_v0 = vadd.f32 %v639_v56, %v573_v54  ;;  %v668_v6 = vadd.f32 %v641_v58, %v574_v55  ;;  %v782_v7 = vmul.f32 %v2047_v57, %v1961_v22  ;;  %v783_v11 = vmul.f32 %v1961_v22, %v2057_v3 }
  0x39   : > { %v733_v12 = vsel %vm522_vm1, %v731_v60, %v732_v61  ;;  %v735_v17 = vsel %vm522_vm1, %v732_v61, %v734_v62  ;;  %v826_v18 = vrot.slane %v781_v63, 2  ;;  %v876_v19 = vmul.f32 %v1963_v23, %v2059_v4 }
  0x3a   : > { %v761_v24 = vadd.f32 %v733_v12, %v667_v0  ;;  %v762_v26 = vadd.f32 %v735_v17, %v668_v6  ;;  %v827_v27 = vrot.slane %v782_v7, 2  ;;  %v829_v28 = vrot.slane %v783_v11, 2 }
  0x3b   : > { %v877_v36 = vmul.f32 %v1963_v23, %v2061_v5  ;;  %v878_v37 = vmul.f32 %v1963_v23, %v2063_v9  ;;  %v920_v25 = vrot.slane %v876_v19, 2  ;;  %v970_v29 = vmul.f32 %v2050_v59, %v2019_v8 }
  0x3c   : > { %v828_v39 = vsel %vm805_vm2, %v826_v18, %v827_v27  ;;  %v830_v40 = vsel %vm805_vm2, %v827_v27, %v829_v28  ;;  %v971_v41 = vmul.f32 %v2055_v1, %v2019_v8  ;;  %v972_v42 = vmul.f32 %v2019_v8, %v2065_v10 }
  0x3d   : > { %v856_v44 = vadd.f32 %v828_v39, %v761_v24  ;;  %v857_v45 = vadd.f32 %v830_v40, %v762_v26  ;;  %v921_v46 = vrot.slane %v877_v36, 2  ;;  %v923_v47 = vrot.slane %v878_v37, 2 }
  0x3e   : > { %v1014_v48 = vrot.slane %v970_v29, 2  ;;  %v1015_v49 = vrot.slane %v971_v41, 2  ;;  %v1017_v50 = vrot.slane %v972_v42, 2  ;;  %v2126_v51 = vunpack.c.l.bf16 %v359_v38 }
  0x3f   : > { %v922_v53 = vsel %vm805_vm2, %v920_v25, %v921_v46  ;;  %v924_v54 = vsel %vm805_vm2, %v921_v46, %v923_v47  ;;  %v2130_v55 = vunpack.c.h.bf16 %v359_v38  ;;  %v2132_v56 = vunpack.c.l.bf16 %v361_v43 }
  0x40   : > { %v950_v58 = vadd.f32 %v922_v53, %v856_v44  ;;  %v951_v60 = vadd.f32 %v924_v54, %v857_v45  ;;  %v1016_v61 = vsel %vm805_vm2, %v1014_v48, %v1015_v49  ;;  %v1018_v62 = vsel %vm805_vm2, %v1015_v49, %v1017_v50 }
  0x41   : > { %v416_v63 = vmul.f32 %v1946_v13, %v1970_v30  ;;  %v417_v0 = vmul.f32 %v1946_v13, %v1976_v33  ;;  %v432_v6 = vmul.f32 %v1972_v31, %v1948_v14  ;;  %v433_v7 = vmul.f32 %v1974_v32, %v1948_v14 }
  0x42   : > { %v1044_v11 = vadd.f32 %v1016_v61, %v950_v58  ;;  %v1045_v12 = vadd.f32 %v1018_v62, %v951_v60  ;;  %v460_v17 = vmul.f32 %v1950_v15, %v2126_v51  ;;  %v461_v18 = vmul.f32 %v1950_v15, %v2130_v55 }
  0x43   : > { %v444_v19 = vadd.f32 %v432_v6, %v416_v63  ;;  %v445_v24 = vadd.f32 %v433_v7, %v417_v0  ;;  %v489_v26 = vmul.f32 %v1952_v16, %v1970_v30  ;;  %v490_v27 = vmul.f32 %v1952_v16, %v1976_v33 }
  0x44   : > { %v1052_v28 = vpack.c.bf16 %v1045_v12, %v1044_v11  ;;  %v491_v36 = vmul.f32 %v1952_v16, %v1978_v34  ;;  %v584_v37 = vmul.f32 %v1972_v31, %v1957_v20  ;;  %v585_v25 = vmul.f32 %v1974_v32, %v1957_v20 }
  0x45   : > { %v472_v29 = vadd.f32 %v460_v17, %v444_v19  ;;  %v473_v38 = vadd.f32 %v461_v18, %v445_v24  ;;  %v528_v39 = vrot.slane %v489_v26, 1  ;;  %v529_v40 = vrot.slane %v490_v27, 1 }
  0x46   : > { %1751 = vmatprep.mubr.msk.bf16.mxu1 %vm1060_vm3, %v1052_v28  ;;  %v531_v41 = vrot.slane %v491_v36, 1  ;;  %v586_v42 = vmul.f32 %v1957_v20, %v1980_v35  ;;  %v622_v43 = vrot.slane %v584_v37, 1  ;;  %v623_v44 = vrot.slane %v585_v25, 1 }
  0x47   : > { %v530_v45 = vsel %vm522_vm1, %v528_v39, %v529_v40  ;;  %v678_v46 = vmul.f32 %v1959_v21, %v2126_v51  ;;  %v679_v47 = vmul.f32 %v1959_v21, %v2130_v55  ;;  %v680_v48 = vmul.f32 %v1959_v21, %v2132_v56 }
  0x48   : > { %v532_v49 = vsel %vm522_vm1, %v529_v40, %v531_v41  ;;  %v567_v50 = vadd.f32 %v530_v45, %v472_v29  ;;  %v624_v53 = vsel %vm522_vm1, %v622_v43, %v623_v44  ;;  %v625_v54 = vrot.slane %v586_v42, 1 }
  0x49   : > { %v568_v58 = vadd.f32 %v532_v49, %v473_v38  ;;  %v716_v60 = vrot.slane %v678_v46, 1  ;;  %v717_v61 = vrot.slane %v679_v47, 1  ;;  %v719_v62 = vrot.slane %v680_v48, 1  ;;  %v371_v38 = vld [vmem:[%s1944_s15 + $0x54] sm:$0xff]   ;;  %v373_v47 = vld [vmem:[%s1944_s15 + $0x5c] sm:$0x1] }
  0x4a   : > { %v626_v63 = vsel %vm522_vm1, %v623_v44, %v625_v54  ;;  %v661_v0 = vadd.f32 %v624_v53, %v567_v50  ;;  %v772_v6 = vmul.f32 %v1961_v22, %v1970_v30  ;;  %v773_v7 = vmul.f32 %v1961_v22, %v1976_v33 }
  0x4b   : > { %v662_v11 = vadd.f32 %v626_v63, %v568_v58  ;;  %v718_v12 = vsel %vm522_vm1, %v716_v60, %v717_v61  ;;  %v720_v17 = vsel %vm522_vm1, %v717_v61, %v719_v62  ;;  %v774_v18 = vmul.f32 %v1961_v22, %v1978_v34 }
  0x4c   : > { %v755_v19 = vadd.f32 %v718_v12, %v661_v0  ;;  %v811_v24 = vrot.slane %v772_v6, 2  ;;  %v812_v26 = vrot.slane %v773_v7, 2  ;;  %v867_v27 = vmul.f32 %v1972_v31, %v1963_v23 }
  0x4d   : > { %v756_v28 = vadd.f32 %v720_v17, %v662_v11  ;;  %v814_v30 = vrot.slane %v774_v18, 2  ;;  %v868_v33 = vmul.f32 %v1974_v32, %v1963_v23  ;;  %v869_v36 = vmul.f32 %v1963_v23, %v1980_v35 }
  0x4e   : > { %v813_v37 = vsel %vm805_vm2, %v811_v24, %v812_v26  ;;  %v905_v25 = vrot.slane %v867_v27, 2  ;;  %v961_v34 = vmul.f32 %v2019_v8, %v2126_v51  ;;  %v962_v29 = vmul.f32 %v2019_v8, %v2130_v55 }
  0x4f   : > { %v815_v39 = vsel %vm805_vm2, %v812_v26, %v814_v30  ;;  %v850_v40 = vadd.f32 %v813_v37, %v755_v19  ;;  %v906_v41 = vrot.slane %v868_v33, 2  ;;  %v908_v42 = vrot.slane %v869_v36, 2 }
  0x50   : > { %v851_v43 = vadd.f32 %v815_v39, %v756_v28  ;;  %v963_v44 = vmul.f32 %v2019_v8, %v2132_v56  ;;  %v999_v45 = vrot.slane %v961_v34, 2  ;;  %v1000_v46 = vrot.slane %v962_v29, 2 }
  0x51   : > { %v907_v48 = vsel %vm805_vm2, %v905_v25, %v906_v41  ;;  %v909_v49 = vsel %vm805_vm2, %v906_v41, %v908_v42  ;;  %v2197_v50 = vunpack.c.l.bf16 %v371_v38  ;;  %v2199_v53 = vunpack.c.h.bf16 %v371_v38 }
  0x52   : > { %v944_v54 = vadd.f32 %v907_v48, %v850_v40  ;;  %v945_v58 = vadd.f32 %v909_v49, %v851_v43  ;;  %v1001_v60 = vsel %vm805_vm2, %v999_v45, %v1000_v46  ;;  %v1002_v61 = vrot.slane %v963_v44, 2 }
  0x53   : > { %v2202_v62 = vunpack.c.l.bf16 %v373_v47  ;;  %v424_v63 = vmul.f32 %v1946_v13, %v2059_v4  ;;  %v425_v0 = vmul.f32 %v1946_v13, %v2061_v5  ;;  %v440_v6 = vmul.f32 %v2050_v59, %v1948_v14 }
  0x54   : > { %v1003_v7 = vsel %vm805_vm2, %v1000_v46, %v1002_v61  ;;  %v1038_v11 = vadd.f32 %v1001_v60, %v944_v54  ;;  %v441_v12 = vmul.f32 %v2055_v1, %v1948_v14  ;;  %v468_v17 = vmul.f32 %v1950_v15, %v2197_v50 }
  0x55   : > { %v1039_v18 = vadd.f32 %v1003_v7, %v945_v58  ;;  %v452_v19 = vadd.f32 %v440_v6, %v424_v63  ;;  %v469_v24 = vmul.f32 %v1950_v15, %v2199_v53  ;;  %v501_v26 = vmul.f32 %v1952_v16, %v2059_v4 }
  0x56   : > { %v453_v27 = vadd.f32 %v441_v12, %v425_v0  ;;  %v502_v28 = vmul.f32 %v1952_v16, %v2061_v5  ;;  %v503_v30 = vmul.f32 %v1952_v16, %v2063_v9  ;;  %v596_v33 = vmul.f32 %v2050_v59, %v1957_v20 }
  0x57   : > { %v1049_v36 = vpack.c.bf16 %v1039_v18, %v1038_v11  ;;  %v480_v37 = vadd.f32 %v468_v17, %v452_v19  ;;  %v548_v25 = vrot.slane %v501_v26, 1  ;;  %v597_v34 = vmul.f32 %v2055_v1, %v1957_v20 }
  0x58   : > { %v481_v29 = vadd.f32 %v469_v24, %v453_v27  ;;  %v549_v38 = vrot.slane %v502_v28, 1  ;;  %v551_v39 = vrot.slane %v503_v30, 1  ;;  %v598_v40 = vmul.f32 %v1957_v20, %v2065_v10 }
  0x59   : > { %1744 = vmatmul.mubr.msk.bf16.vlgmr.msra.gmra.mrb[0].mxu0 %vm1060_vm3, %v1049_v36  ;;  %v642_v41 = vrot.slane %v596_v33, 1  ;;  %v643_v42 = vrot.slane %v597_v34, 1  ;;  %v690_v43 = vmul.f32 %v1959_v21, %v2197_v50  ;;  %v691_v44 = vmul.f32 %v1959_v21, %v2199_v53 }
  0x5a   : > { %v550_v45 = vsel %vm522_vm1, %v548_v25, %v549_v38  ;;  %v552_v46 = vsel %vm522_vm1, %v549_v38, %v551_v39  ;;  %v645_v47 = vrot.slane %v598_v40, 1  ;;  %v692_v48 = vmul.f32 %v1959_v21, %v2202_v62 }
  0x5b   : > { %v575_v49 = vadd.f32 %v550_v45, %v480_v37  ;;  %v576_v54 = vadd.f32 %v552_v46, %v481_v29  ;;  %v644_v58 = vsel %vm522_vm1, %v642_v41, %v643_v42  ;;  %v736_v60 = vrot.slane %v690_v43, 1 }
  0x5c   : > { %v646_v61 = vsel %vm522_vm1, %v643_v42, %v645_v47  ;;  %v737_v63 = vrot.slane %v691_v44, 1  ;;  %v739_v0 = vrot.slane %v692_v48, 1  ;;  %v784_v6 = vmul.f32 %v1961_v22, %v2059_v4 }
  0x5d   : > { %v669_v7 = vadd.f32 %v644_v58, %v575_v49  ;;  %v670_v11 = vadd.f32 %v646_v61, %v576_v54  ;;  %v785_v12 = vmul.f32 %v1961_v22, %v2061_v5  ;;  %v786_v17 = vmul.f32 %v1961_v22, %v2063_v9 }
  0x5e   : > { %v738_v18 = vsel %vm522_vm1, %v736_v60, %v737_v63  ;;  %v740_v19 = vsel %vm522_vm1, %v737_v63, %v739_v0  ;;  %v831_v24 = vrot.slane %v784_v6, 2  ;;  %v879_v26 = vmul.f32 %v2050_v59, %v1963_v23 }
  0x5f   : > { %v763_v27 = vadd.f32 %v738_v18, %v669_v7  ;;  %v764_v28 = vadd.f32 %v740_v19, %v670_v11  ;;  %v832_v30 = vrot.slane %v785_v12, 2  ;;  %v834_v33 = vrot.slane %v786_v17, 2 }
  0x60   : > { %v880_v36 = vmul.f32 %v2055_v1, %v1963_v23  ;;  %v881_v37 = vmul.f32 %v1963_v23, %v2065_v10  ;;  %v925_v25 = vrot.slane %v879_v26, 2  ;;  %v973_v34 = vmul.f32 %v2019_v8, %v2197_v50 }
  0x61   : > { %v833_v29 = vsel %vm805_vm2, %v831_v24, %v832_v30  ;;  %v835_v38 = vsel %vm805_vm2, %v832_v30, %v834_v33  ;;  %v974_v39 = vmul.f32 %v2019_v8, %v2199_v53  ;;  %v975_v40 = vmul.f32 %v2019_v8, %v2202_v62 }
  0x62   : > { %v858_v41 = vadd.f32 %v833_v29, %v763_v27  ;;  %v859_v42 = vadd.f32 %v835_v38, %v764_v28  ;;  %v926_v43 = vrot.slane %v880_v36, 2  ;;  %v928_v44 = vrot.slane %v881_v37, 2 }
  0x63   : > { %v1019_v45 = vrot.slane %v973_v34, 2  ;;  %v1020_v46 = vrot.slane %v974_v39, 2  ;;  %v1022_v47 = vrot.slane %v975_v40, 2  ;;  %v418_v48 = vmul.f32 %v1972_v31, %v1946_v13 }
  0x64   : > { %v927_v49 = vsel %vm805_vm2, %v925_v25, %v926_v43  ;;  %v929_v54 = vsel %vm805_vm2, %v926_v43, %v928_v44  ;;  %v419_v58 = vmul.f32 %v1974_v32, %v1946_v13  ;;  %v434_v60 = vmul.f32 %v1948_v14, %v2126_v51 }
  0x65   : > { %v952_v61 = vadd.f32 %v927_v49, %v858_v41  ;;  %v953_v63 = vadd.f32 %v929_v54, %v859_v42  ;;  %v1021_v0 = vsel %vm805_vm2, %v1019_v45, %v1020_v46  ;;  %v1023_v6 = vsel %vm805_vm2, %v1020_v46, %v1022_v47 }
  0x66   : > { %v435_v7 = vmul.f32 %v1948_v14, %v2130_v55  ;;  %v446_v11 = vadd.f32 %v434_v60, %v418_v48  ;;  %v462_v12 = vmul.f32 %v2041_v52, %v1950_v15  ;;  %v463_v17 = vmul.f32 %v2047_v57, %v1950_v15 }
  0x67   : > { %v1046_v18 = vadd.f32 %v1021_v0, %v952_v61  ;;  %v1047_v19 = vadd.f32 %v1023_v6, %v953_v63  ;;  %v492_v24 = vmul.f32 %v1972_v31, %v1952_v16  ;;  %v493_v26 = vmul.f32 %v1974_v32, %v1952_v16 }
  0x68   : > { %v447_v27 = vadd.f32 %v435_v7, %v419_v58  ;;  %v474_v28 = vadd.f32 %v462_v12, %v446_v11  ;;  %v494_v30 = vmul.f32 %v1952_v16, %v1980_v35  ;;  %v587_v33 = vmul.f32 %v1957_v20, %v2126_v51 }
  0x69   : > { %v1053_v36 = vpack.c.bf16 %v1047_v19, %v1046_v18  ;;  %v533_v37 = vrot.slane %v492_v24, 1  ;;  %v534_v25 = vrot.slane %v493_v26, 1  ;;  %v588_v34 = vmul.f32 %v1957_v20, %v2130_v55 }
  0x6a   : > { %v475_v29 = vadd.f32 %v463_v17, %v447_v27  ;;  %v536_v38 = vrot.slane %v494_v30, 1  ;;  %v589_v39 = vmul.f32 %v1957_v20, %v2132_v56  ;;  %v627_v40 = vrot.slane %v587_v33, 1 }
  0x6b   : > { %1752 = vmatmul.mubr.msk.bf16.vlgmr.msra.gmra.mrb[0].mxu1 %vm1060_vm3, %v1053_v36  ;;  %v535_v41 = vsel %vm522_vm1, %v533_v37, %v534_v25  ;;  %v628_v42 = vrot.slane %v588_v34, 1  ;;  %v681_v43 = vmul.f32 %v2041_v52, %v1959_v21  ;;  %v682_v44 = vmul.f32 %v2047_v57, %v1959_v21  ;;  %v1723_v36 = vld [vmem:[%s2313_s30] sm:$0xff]  }
  0x6c   : > { %1756 = vmatpush3.bf16.msra.mxu1 %v1921_v2  ;;  %v537_v45 = vsel %vm522_vm1, %v534_v25, %v536_v38  ;;  %v569_v46 = vadd.f32 %v535_v41, %v474_v28  ;;  %v630_v47 = vrot.slane %v589_v39, 1  ;;  %v683_v48 = vmul.f32 %v1959_v21, %v2057_v3  ;;  %v400_v38 = vld [vmem:[%s2313_s30 + $0x8] sm:$0x1] }
  0x6d   : > { %v570_v49 = vadd.f32 %v537_v45, %v475_v29  ;;  %v629_v54 = vsel %vm522_vm1, %v627_v40, %v628_v42  ;;  %v721_v58 = vrot.slane %v681_v43, 1  ;;  %v722_v60 = vrot.slane %v682_v44, 1 }
  0x6e   : > { %v631_v61 = vsel %vm522_vm1, %v628_v42, %v630_v47  ;;  %v663_v63 = vadd.f32 %v629_v54, %v569_v46  ;;  %v724_v0 = vrot.slane %v683_v48, 1  ;;  %v775_v2 = vmul.f32 %v1972_v31, %v1961_v22 }
  0x6f   : > { %v664_v6 = vadd.f32 %v631_v61, %v570_v49  ;;  %v723_v7 = vsel %vm522_vm1, %v721_v58, %v722_v60  ;;  %v776_v11 = vmul.f32 %v1974_v32, %v1961_v22  ;;  %v777_v12 = vmul.f32 %v1961_v22, %v1980_v35 }
  0x70   : > { %v725_v17 = vsel %vm522_vm1, %v722_v60, %v724_v0  ;;  %v757_v18 = vadd.f32 %v723_v7, %v663_v63  ;;  %v816_v31 = vrot.slane %v775_v2, 2  ;;  %v870_v19 = vmul.f32 %v1963_v23, %v2126_v51 }
  0x71   : > { %v758_v24 = vadd.f32 %v725_v17, %v664_v6  ;;  %v817_v26 = vrot.slane %v776_v11, 2  ;;  %v819_v32 = vrot.slane %v777_v12, 2  ;;  %v871_v35 = vmul.f32 %v1963_v23, %v2130_v55 }
  0x72   : > { %v872_v27 = vmul.f32 %v1963_v23, %v2132_v56  ;;  %v910_v28 = vrot.slane %v870_v19, 2  ;;  %v964_v30 = vmul.f32 %v2041_v52, %v2019_v8  ;;  %v965_v33 = vmul.f32 %v2047_v57, %v2019_v8 }
  0x73   : > { %v818_v37 = vsel %vm805_vm2, %v816_v31, %v817_v26  ;;  %v820_v25 = vsel %vm805_vm2, %v817_v26, %v819_v32  ;;  %v911_v34 = vrot.slane %v871_v35, 2  ;;  %v966_v29 = vmul.f32 %v2019_v8, %v2057_v3 }
  0x74   : > { %v852_v39 = vadd.f32 %v818_v37, %v757_v18  ;;  %v853_v40 = vadd.f32 %v820_v25, %v758_v24  ;;  %v913_v41 = vrot.slane %v872_v27, 2  ;;  %v1004_v42 = vrot.slane %v964_v30, 2 }
  0x75   : > { %v912_v43 = vsel %vm805_vm2, %v910_v28, %v911_v34  ;;  %v1005_v44 = vrot.slane %v965_v33, 2  ;;  %v1007_v45 = vrot.slane %v966_v29, 2  ;;  %v2333_v46 = vunpack.c.l.bf16 %v1723_v36 }
  0x76   : > { %v914_v47 = vsel %vm805_vm2, %v911_v34, %v913_v41  ;;  %v946_v48 = vadd.f32 %v912_v43, %v852_v39  ;;  %v2336_v49 = vunpack.c.h.bf16 %v1723_v36  ;;  %v2338_v54 = vunpack.c.l.bf16 %v400_v38 }
  0x77   : > { %v947_v58 = vadd.f32 %v914_v47, %v853_v40  ;;  %v1006_v60 = vsel %vm805_vm2, %v1004_v42, %v1005_v44  ;;  %v1008_v61 = vsel %vm805_vm2, %v1005_v44, %v1007_v45  ;;  %v1249_v63 = vmul.f32 %v2050_v59, %v1946_v13 }
  0x78   : > { %v1040_v0 = vadd.f32 %v1006_v60, %v946_v48  ;;  %v1250_v2 = vmul.f32 %v2055_v1, %v1946_v13  ;;  %v1253_v6 = vmul.f32 %v1948_v14, %v2197_v50  ;;  %v1254_v7 = vmul.f32 %v1948_v14, %v2199_v53 }
  0x79   : > { %v1041_v11 = vadd.f32 %v1008_v61, %v947_v58  ;;  %v1261_v12 = vmul.f32 %v2333_v46, %v1950_v15  ;;  %v1262_v17 = vmul.f32 %v2336_v49, %v1950_v15  ;;  %v1269_v18 = vmul.f32 %v2050_v59, %v1952_v16 }
  0x7a   : > { %v1257_v31 = vadd.f32 %v1253_v6, %v1249_v63  ;;  %v1258_v19 = vadd.f32 %v1254_v7, %v1250_v2  ;;  %v1270_v24 = vmul.f32 %v2055_v1, %v1952_v16  ;;  %v1271_v26 = vmul.f32 %v1952_v16, %v2065_v10 }
  0x7b   : > { %v1050_v32 = vpack.c.bf16 %v1041_v11, %v1040_v0  ;;  %v1281_v35 = vrot.slane %v1269_v18, 1  ;;  %v1299_v27 = vmul.f32 %v1957_v20, %v2197_v50  ;;  %v1300_v28 = vmul.f32 %v1957_v20, %v2199_v53 }
  0x7c   : > { %v1265_v30 = vadd.f32 %v1261_v12, %v1257_v31  ;;  %v1266_v33 = vadd.f32 %v1262_v17, %v1258_v19  ;;  %v1282_v36 = vrot.slane %v1270_v24, 1  ;;  %v1284_v37 = vrot.slane %v1271_v26, 1 }
  0x7d   : > { %1747 = vmatprep.mubr.msk.bf16.mxu0 %vm1060_vm3, %v1050_v32  ;;  %v1301_v25 = vmul.f32 %v1957_v20, %v2202_v62  ;;  %v1311_v34 = vrot.slane %v1299_v27, 1  ;;  %v1312_v29 = vrot.slane %v1300_v28, 1  ;;  %v1329_v38 = vmul.f32 %v2333_v46, %v1959_v21 }
  0x7e   : > { %v1283_v39 = vsel %vm522_vm1, %v1281_v35, %v1282_v36  ;;  %v1285_v40 = vsel %vm522_vm1, %v1282_v36, %v1284_v37  ;;  %v1330_v41 = vmul.f32 %v2336_v49, %v1959_v21  ;;  %v1331_v42 = vmul.f32 %v1959_v21, %v2338_v54 }
  0x7f   : > { %v1295_v43 = vadd.f32 %v1283_v39, %v1265_v30  ;;  %v1296_v44 = vadd.f32 %v1285_v40, %v1266_v33  ;;  %v1313_v45 = vsel %vm522_vm1, %v1311_v34, %v1312_v29  ;;  %v1314_v47 = vrot.slane %v1301_v25, 1 }
  0x80   : > { %v1341_v48 = vrot.slane %v1329_v38, 1  ;;  %v1342_v58 = vrot.slane %v1330_v41, 1  ;;  %v1344_v60 = vrot.slane %v1331_v42, 1  ;;  %v1359_v61 = vmul.f32 %v2050_v59, %v1961_v22 }
  0x81   : > { %v1315_v63 = vsel %vm522_vm1, %v1312_v29, %v1314_v47  ;;  %v1325_v0 = vadd.f32 %v1313_v45, %v1295_v43  ;;  %v1360_v2 = vmul.f32 %v2055_v1, %v1961_v22  ;;  %v1361_v6 = vmul.f32 %v1961_v22, %v2065_v10 }
  0x82   : > { %v1326_v7 = vadd.f32 %v1315_v63, %v1296_v44  ;;  %v1343_v11 = vsel %vm522_vm1, %v1341_v48, %v1342_v58  ;;  %v1345_v12 = vsel %vm522_vm1, %v1342_v58, %v1344_v60  ;;  %v1371_v17 = vrot.slane %v1359_v61, 2 }
  0x83   : > { %v1355_v18 = vadd.f32 %v1343_v11, %v1325_v0  ;;  %v1372_v31 = vrot.slane %v1360_v2, 2  ;;  %v1374_v19 = vrot.slane %v1361_v6, 2  ;;  %v1389_v59 = vmul.f32 %v1963_v23, %v2197_v50 }
  0x84   : > { %v1356_v24 = vadd.f32 %v1345_v12, %v1326_v7  ;;  %v1390_v26 = vmul.f32 %v1963_v23, %v2199_v53  ;;  %v1391_v1 = vmul.f32 %v1963_v23, %v2202_v62  ;;  %v1419_v10 = vmul.f32 %v2333_v46, %v2019_v8 }
  0x85   : > { %v1373_v32 = vsel %vm805_vm2, %v1371_v17, %v1372_v31  ;;  %v1375_v35 = vsel %vm805_vm2, %v1372_v31, %v1374_v19  ;;  %v1401_v27 = vrot.slane %v1389_v59, 2  ;;  %v1420_v28 = vmul.f32 %v2336_v49, %v2019_v8 }
  0x86   : > { %v1385_v30 = vadd.f32 %v1373_v32, %v1355_v18  ;;  %v1386_v33 = vadd.f32 %v1375_v35, %v1356_v24  ;;  %v1402_v36 = vrot.slane %v1390_v26, 2  ;;  %v1404_v37 = vrot.slane %v1391_v1, 2 }
  0x87   : > { %v1421_v25 = vmul.f32 %v2019_v8, %v2338_v54  ;;  %v1431_v34 = vrot.slane %v1419_v10, 2  ;;  %v1432_v29 = vrot.slane %v1420_v28, 2  ;;  %v420_v38 = vmul.f32 %v1946_v13, %v2126_v51 }
  0x88   : > { %v1403_v39 = vsel %vm805_vm2, %v1401_v27, %v1402_v36  ;;  %v1405_v40 = vsel %vm805_vm2, %v1402_v36, %v1404_v37  ;;  %v421_v41 = vmul.f32 %v1946_v13, %v2130_v55  ;;  %v436_v42 = vmul.f32 %v2041_v52, %v1948_v14 }
  0x89   : > { %v1415_v43 = vadd.f32 %v1403_v39, %v1385_v30  ;;  %v1416_v44 = vadd.f32 %v1405_v40, %v1386_v33  ;;  %v1433_v45 = vsel %vm805_vm2, %v1431_v34, %v1432_v29  ;;  %v1434_v47 = vrot.slane %v1421_v25, 2 }
  0x8a   : > { %v437_v48 = vmul.f32 %v2047_v57, %v1948_v14  ;;  %v448_v58 = vadd.f32 %v436_v42, %v420_v38  ;;  %v464_v60 = vmul.f32 %v1950_v15, %v2059_v4  ;;  %v465_v61 = vmul.f32 %v1950_v15, %v2061_v5 }
  0x8b   : > { %v1435_v63 = vsel %vm805_vm2, %v1432_v29, %v1434_v47  ;;  %v1445_v0 = vadd.f32 %v1433_v45, %v1415_v43  ;;  %v495_v2 = vmul.f32 %v1952_v16, %v2126_v51  ;;  %v496_v6 = vmul.f32 %v1952_v16, %v2130_v55 }
  0x8c   : > { %v1446_v7 = vadd.f32 %v1435_v63, %v1416_v44  ;;  %v449_v11 = vadd.f32 %v437_v48, %v421_v41  ;;  %v476_v12 = vadd.f32 %v464_v60, %v448_v58  ;;  %v497_v17 = vmul.f32 %v1952_v16, %v2132_v56 }
  0x8d   : > { %v538_v18 = vrot.slane %v495_v2, 1  ;;  %v539_v31 = vrot.slane %v496_v6, 1  ;;  %v590_v19 = vmul.f32 %v2041_v52, %v1957_v20  ;;  %v591_v59 = vmul.f32 %v2047_v57, %v1957_v20 }
  0x8e   : > { %v1449_v24 = vpack.c.bf16 %v1446_v7, %v1445_v0  ;;  %v477_v26 = vadd.f32 %v465_v61, %v449_v11  ;;  %v541_v1 = vrot.slane %v497_v17, 1  ;;  %v592_v10 = vmul.f32 %v1957_v20, %v2057_v3  ;;  %v401_v11 = vld [vmem:[%s2313_s30 + $0xc] sm:$0xff]  }
  0x8f   : > { %v540_v32 = vsel %vm522_vm1, %v538_v18, %v539_v31  ;;  %v632_v35 = vrot.slane %v590_v19, 1  ;;  %v633_v27 = vrot.slane %v591_v59, 1  ;;  %v684_v28 = vmul.f32 %v1959_v21, %v2059_v4  ;;  %v2460_v18 = vld [vmem:[%s2313_s30 + $0x14] sm:$0x1] }
  0x90   : > { %1757 = vmatprep.mubr.msk.bf16.mxu1 %vm1060_vm3, %v1449_v24  ;;  %v542_v30 = vsel %vm522_vm1, %v539_v31, %v541_v1  ;;  %v571_v33 = vadd.f32 %v540_v32, %v476_v12  ;;  %v635_v36 = vrot.slane %v592_v10, 1  ;;  %v685_v37 = vmul.f32 %v1959_v21, %v2061_v5 }
  0x91   : > { %v572_v25 = vadd.f32 %v542_v30, %v477_v26  ;;  %v634_v34 = vsel %vm522_vm1, %v632_v35, %v633_v27  ;;  %v686_v29 = vmul.f32 %v1959_v21, %v2063_v9  ;;  %v726_v38 = vrot.slane %v684_v28, 1 }
  0x92   : > { %v636_v39 = vsel %vm522_vm1, %v633_v27, %v635_v36  ;;  %v665_v40 = vadd.f32 %v634_v34, %v571_v33  ;;  %v727_v41 = vrot.slane %v685_v37, 1  ;;  %v778_v42 = vmul.f32 %v1961_v22, %v2126_v51 }
  0x93   : > { %v666_v43 = vadd.f32 %v636_v39, %v572_v25  ;;  %v729_v44 = vrot.slane %v686_v29, 1  ;;  %v779_v45 = vmul.f32 %v1961_v22, %v2130_v55  ;;  %v780_v47 = vmul.f32 %v1961_v22, %v2132_v56 }
  0x94   : > { %v728_v48 = vsel %vm522_vm1, %v726_v38, %v727_v41  ;;  %v821_v58 = vrot.slane %v778_v42, 2  ;;  %v873_v60 = vmul.f32 %v2041_v52, %v1963_v23  ;;  %v874_v61 = vmul.f32 %v2047_v57, %v1963_v23 }
  0x95   : > { %v730_v51 = vsel %vm522_vm1, %v727_v41, %v729_v44  ;;  %v759_v63 = vadd.f32 %v728_v48, %v665_v40  ;;  %v822_v0 = vrot.slane %v779_v45, 2  ;;  %v824_v2 = vrot.slane %v780_v47, 2 }
  0x96   : > { %v760_v6 = vadd.f32 %v730_v51, %v666_v43  ;;  %v875_v55 = vmul.f32 %v1963_v23, %v2057_v3  ;;  %v915_v56 = vrot.slane %v873_v60, 2  ;;  %v916_v7 = vrot.slane %v874_v61, 2 }
  0x97   : > { %v823_v12 = vsel %vm805_vm2, %v821_v58, %v822_v0  ;;  %v825_v17 = vsel %vm805_vm2, %v822_v0, %v824_v2  ;;  %v967_v52 = vmul.f32 %v2019_v8, %v2059_v4  ;;  %v968_v57 = vmul.f32 %v2019_v8, %v2061_v5 }
  0x98   : > { %v854_v31 = vadd.f32 %v823_v12, %v759_v63  ;;  %v855_v19 = vadd.f32 %v825_v17, %v760_v6  ;;  %v917_v59 = vsel %vm805_vm2, %v915_v56, %v916_v7  ;;  %v918_v3 = vrot.slane %v875_v55, 2 }
  0x99   : > { %v969_v24 = vmul.f32 %v2019_v8, %v2063_v9  ;;  %v1009_v26 = vrot.slane %v967_v52, 2  ;;  %v1010_v1 = vrot.slane %v968_v57, 2  ;;  %v2465_v10 = vunpack.c.l.bf16 %v401_v11 }
  0x9a   : > { %v919_v32 = vsel %vm805_vm2, %v916_v7, %v918_v3  ;;  %v948_v4 = vadd.f32 %v917_v59, %v854_v31  ;;  %v2468_v35 = vunpack.c.h.bf16 %v401_v11  ;;  %v409_v5 = vunpack.c.l.bf16 %v2460_v18  ;;  %v2542_v18 = vld [vmem:[%s2616_s4] ss:$0 sm:$0xff] }
  0x9b   : > { %v949_v27 = vadd.f32 %v919_v32, %v855_v19  ;;  %v1011_v28 = vsel %vm805_vm2, %v1009_v26, %v1010_v1  ;;  %v1012_v30 = vrot.slane %v969_v24, 2  ;;  %v1251_v33 = vmul.f32 %v1946_v13, %v2197_v50 }
  0x9c   : > { %v1042_v36 = vadd.f32 %v1011_v28, %v948_v4  ;;  %v1252_v8 = vmul.f32 %v1946_v13, %v2199_v53  ;;  %v1255_v9 = vmul.f32 %v2333_v46, %v1948_v14  ;;  %v1256_v37 = vmul.f32 %v2336_v49, %v1948_v14 }
  0x9d   : > { %v1013_v25 = vsel %vm805_vm2, %v1010_v1, %v1012_v30  ;;  %v1263_v34 = vmul.f32 %v1950_v15, %v2465_v10  ;;  %v1264_v29 = vmul.f32 %v1950_v15, %v2468_v35  ;;  %v1272_v38 = vmul.f32 %v1952_v16, %v2197_v50 }
  0x9e   : > { %v1043_v39 = vadd.f32 %v1013_v25, %v949_v27  ;;  %v1259_v40 = vadd.f32 %v1255_v9, %v1251_v33  ;;  %v1260_v13 = vadd.f32 %v1256_v37, %v1252_v8  ;;  %v1273_v41 = vmul.f32 %v1952_v16, %v2199_v53 }
  0x9f   : > { %v1274_v14 = vmul.f32 %v1952_v16, %v2202_v62  ;;  %v1286_v42 = vrot.slane %v1272_v38, 1  ;;  %v1302_v43 = vmul.f32 %v2333_v46, %v1957_v20  ;;  %v1303_v44 = vmul.f32 %v2336_v49, %v1957_v20 }
  0xa0   : > { %v1051_v15 = vpack.c.bf16 %v1043_v39, %v1042_v36  ;;  %v1267_v45 = vadd.f32 %v1263_v34, %v1259_v40  ;;  %v1268_v47 = vadd.f32 %v1264_v29, %v1260_v13  ;;  %v1287_v48 = vrot.slane %v1273_v41, 1 }
  0xa1   : > { %v1289_v58 = vrot.slane %v1274_v14, 1  ;;  %v1304_v60 = vmul.f32 %v1957_v20, %v2338_v54  ;;  %v1316_v61 = vrot.slane %v1302_v43, 1  ;;  %v1317_v51 = vrot.slane %v1303_v44, 1 }
  0xa2   : > { %1748 = vmatmul.mubr.msk.bf16.gmra.mrb[4].mxu0 %vm1060_vm3, %v1051_v15  ;;  %v1288_v16 = vsel %vm522_vm1, %v1286_v42, %v1287_v48  ;;  %v1332_v63 = vmul.f32 %v1959_v21, %v2465_v10  ;;  %v1333_v0 = vmul.f32 %v1959_v21, %v2468_v35  ;;  %v1334_v2 = vmul.f32 %v1959_v21, %v409_v5 }
  0xa3   : > { %v1290_v6 = vsel %vm522_vm1, %v1287_v48, %v1289_v58  ;;  %v1297_v55 = vadd.f32 %v1288_v16, %v1267_v45  ;;  %v1318_v20 = vsel %vm522_vm1, %v1316_v61, %v1317_v51  ;;  %v1319_v56 = vrot.slane %v1304_v60, 1 }
  0xa4   : > { %v1298_v7 = vadd.f32 %v1290_v6, %v1268_v47  ;;  %v1346_v11 = vrot.slane %v1332_v63, 1  ;;  %v1347_v12 = vrot.slane %v1333_v0, 1  ;;  %v1349_v17 = vrot.slane %v1334_v2, 1 }
  0xa5   : > { %v1320_v52 = vsel %vm522_vm1, %v1317_v51, %v1319_v56  ;;  %v1327_v57 = vadd.f32 %v1318_v20, %v1297_v55  ;;  %v1362_v31 = vmul.f32 %v1961_v22, %v2197_v50  ;;  %v1363_v19 = vmul.f32 %v1961_v22, %v2199_v53 }
  0xa6   : > { %v1328_v21 = vadd.f32 %v1320_v52, %v1298_v7  ;;  %v1348_v59 = vsel %vm522_vm1, %v1346_v11, %v1347_v12  ;;  %v1350_v3 = vsel %vm522_vm1, %v1347_v12, %v1349_v17  ;;  %v1364_v24 = vmul.f32 %v1961_v22, %v2202_v62  ;;  %v1809_v22 = vld [vmem:[%s2614_s2 + $0x8] ss:$0 sm:$0xff] }
  0xa7   : > { %v1357_v26 = vadd.f32 %v1348_v59, %v1327_v57  ;;  %v1376_v1 = vrot.slane %v1362_v31, 2  ;;  %v1377_v32 = vrot.slane %v1363_v19, 2  ;;  %v1392_v4 = vmul.f32 %v2333_v46, %v1963_v23 }
  0xa8   : > { %v1358_v27 = vadd.f32 %v1350_v3, %v1328_v21  ;;  %v1379_v28 = vrot.slane %v1364_v24, 2  ;;  %v1393_v50 = vmul.f32 %v2336_v49, %v1963_v23  ;;  %v1394_v53 = vmul.f32 %v1963_v23, %v2338_v54 }
  0xa9   : > { %v1378_v30 = vsel %vm805_vm2, %v1376_v1, %v1377_v32  ;;  %v1406_v33 = vrot.slane %v1392_v4, 2  ;;  %v1422_v62 = vmul.f32 %v1809_v22, %v2465_v10  ;;  %v1423_v36 = vmul.f32 %v1809_v22, %v2468_v35 }
  0xaa   : > { %v1380_v46 = vsel %vm805_vm2, %v1377_v32, %v1379_v28  ;;  %v1387_v8 = vadd.f32 %v1378_v30, %v1357_v26  ;;  %v1407_v9 = vrot.slane %v1393_v50, 2  ;;  %v1409_v37 = vrot.slane %v1394_v53, 2 }
  0xab   : > { %v1388_v49 = vadd.f32 %v1380_v46, %v1358_v27  ;;  %v1424_v23 = vmul.f32 %v1809_v22, %v409_v5  ;;  %v1436_v54 = vrot.slane %v1422_v62, 2  ;;  %v1437_v25 = vrot.slane %v1423_v36, 2 }
  0xac   : > { %v1408_v34 = vsel %vm805_vm2, %v1406_v33, %v1407_v9  ;;  %v1410_v29 = vsel %vm805_vm2, %v1407_v9, %v1409_v37 }
  0xad   : > { %v1417_v10 = vadd.f32 %v1408_v34, %v1387_v8  ;;  %v1418_v38 = vadd.f32 %v1410_v29, %v1388_v49  ;;  %v1438_v35 = vsel %vm805_vm2, %v1436_v54, %v1437_v25  ;;  %v1439_v39 = vrot.slane %v1424_v23, 2 }
  0xaf   : > { %v1440_v40 = vsel %vm805_vm2, %v1437_v25, %v1439_v39  ;;  %v1447_v13 = vadd.f32 %v1438_v35, %v1417_v10 }
  0xb0   : > { %v1448_v41 = vadd.f32 %v1440_v40, %v1418_v38 }
  0xb2   : > { %v1450_v14 = vpack.c.bf16 %v1448_v41, %v1447_v13 }
  0xb4   : > { %1758 = vmatmul.mubr.msk.bf16.vlgmr.msra.gmra.mrb[4].mxu1 %vm1060_vm3, %v1450_v14 }
 0x12c   : > { %v1745_v5 = vpop.f32.mrb[0].mxu0 }
 0x12d   : > { %v1126_v42 = vadd.f32 %v1745_v5, %v2542_v18  ;;  %v1117_v43 = vpop.f32.mrb[1].mxu0 }
 0x12e   : > { %v1118_v44 = vadd.f32 %v2542_v18, %v1117_v43  ;;  %v1746_v15 = vpop.f32.mrb[2].mxu0 }
 0x12f   : > { %v1166_v45 = vmax.f32 %v1126_v42, 0.0  ;;  %v1129_v47 = vadd.f32 %v1746_v15, %v2542_v18  ;;  %v1120_v48 = vpop.f32.mrb[3].mxu0 }
 0x130   : > { %v1164_v58 = vmax.f32 %v1118_v44, 0.0  ;;  %v1121_v60 = vadd.f32 %v2542_v18, %v1120_v48 }
 0x131   : > { %v1178_v61 = vmin.f32 %v1166_v45, 6.0  ;;  %v1167_v51 = vmax.f32 %v1129_v47, 0.0 }
 0x132   : > { %v1176_v16 = vmin.f32 %v1164_v58, 6.0  ;;  %v1165_v63 = vmax.f32 %v1121_v60, 0.0 }
 0x133   : > { %v1692_v0 = vpack.c.bf16 %v1178_v61, %v1178_v61  ;;  %v1179_v2 = vmin.f32 %v1167_v51, 6.0 }
 0x134   : > { %v1690_v6 = vpack.c.bf16 %v1176_v16, %v1176_v16  ;;  %v1177_v55 = vmin.f32 %v1165_v63, 6.0 }
 0x135   : > { %1239 = vst.msk [vmem:[%s2551_s14 + $0x8] sm:$0xf] %vm1236_vm4, %v1692_v0  ;;  %v1693_v20 = vpack.c.bf16 %v1179_v2, %v1179_v2 }
 0x136   : > { %1237 = vst.msk [vmem:[%s2551_s14] sm:$0xf] %vm1236_vm4, %v1690_v6  ;;  %v1691_v56 = vpack.c.bf16 %v1177_v55, %v1177_v55 }
 0x137   : > { %1240 = vst.msk [vmem:[%s2551_s14 + $0xc] sm:$0xf] %vm1236_vm4, %v1693_v20 }
 0x138   : > { %1238 = vst.msk [vmem:[%s2551_s14 + $0x4] sm:$0xf] %vm1236_vm4, %v1691_v56 }
 0x13e   : > { %v1753_v7 = vpop.f32.mrb[0].mxu1 }
 0x13f   : > { %v1158_v11 = vadd.f32 %v1753_v7, %v2542_v18  ;;  %v1149_v12 = vpop.f32.mrb[1].mxu1 }
 0x140   : > { %v1150_v17 = vadd.f32 %v2542_v18, %v1149_v12  ;;  %v1754_v52 = vpop.f32.mrb[2].mxu1 }
 0x141   : > { %v1174_v57 = vmax.f32 %v1158_v11, 0.0  ;;  %v1161_v31 = vadd.f32 %v1754_v52, %v2542_v18  ;;  %v1152_v19 = vpop.f32.mrb[3].mxu1 }
 0x142   : > { %v1172_v21 = vmax.f32 %v1150_v17, 0.0  ;;  %v1153_v59 = vadd.f32 %v2542_v18, %v1152_v19 }
 0x143   : > { %v1186_v3 = vmin.f32 %v1174_v57, 6.0  ;;  %v1175_v24 = vmax.f32 %v1161_v31, 0.0 }
 0x144   : > { %v1184_v26 = vmin.f32 %v1172_v21, 6.0  ;;  %v1173_v1 = vmax.f32 %v1153_v59, 0.0 }
 0x145   : > { %v1700_v32 = vpack.c.bf16 %v1186_v3, %v1186_v3  ;;  %v1187_v4 = vmin.f32 %v1175_v24, 6.0 }
 0x146   : > { %v1698_v27 = vpack.c.bf16 %v1184_v26, %v1184_v26  ;;  %v1185_v28 = vmin.f32 %v1173_v1, 6.0 }
 0x147   : > { %1247 = vst.msk [vmem:[%s2551_s14 + $0x28] sm:$0xf] %vm1236_vm4, %v1700_v32  ;;  %v1701_v50 = vpack.c.bf16 %v1187_v4, %v1187_v4 }
 0x148   : > { %1245 = vst.msk [vmem:[%s2551_s14 + $0x20] sm:$0xf] %vm1236_vm4, %v1698_v27  ;;  %v1699_v53 = vpack.c.bf16 %v1185_v28, %v1185_v28 }
 0x149   : > { %1248 = vst.msk [vmem:[%s2551_s14 + $0x2c] sm:$0xf] %vm1236_vm4, %v1701_v50 }
 0x14a   : > { %1246 = vst.msk [vmem:[%s2551_s14 + $0x24] sm:$0xf] %vm1236_vm4, %v1699_v53 }
 0x175   : > { %v1749_v30 = vpop.f32.mrb[4].mxu0 }
 0x176   : > { %v1142_v33 = vadd.f32 %v1749_v30, %v2542_v18  ;;  %v1133_v22 = vpop.f32.mrb[5].mxu0 }
 0x177   : > { %v1134_v62 = vadd.f32 %v2542_v18, %v1133_v22  ;;  %v1750_v36 = vpop.f32.mrb[6].mxu0 }
 0x178   : > { %v1170_v46 = vmax.f32 %v1142_v33, 0.0  ;;  %v1145_v8 = vadd.f32 %v1750_v36, %v2542_v18  ;;  %v1136_v9 = vpop.f32.mrb[7].mxu0 }
 0x179   : > { %v1168_v37 = vmax.f32 %v1134_v62, 0.0  ;;  %v1137_v49 = vadd.f32 %v2542_v18, %v1136_v9 }
 0x17a   : > { %v1182_v23 = vmin.f32 %v1170_v46, 6.0  ;;  %v1171_v54 = vmax.f32 %v1145_v8, 0.0 }
 0x17b   : > { %v1180_v25 = vmin.f32 %v1168_v37, 6.0  ;;  %v1169_v34 = vmax.f32 %v1137_v49, 0.0 }
 0x17c   : > { %v1696_v29 = vpack.c.bf16 %v1182_v23, %v1182_v23  ;;  %v1183_v10 = vmin.f32 %v1171_v54, 6.0 }
 0x17d   : > { %v1694_v38 = vpack.c.bf16 %v1180_v25, %v1180_v25  ;;  %v1181_v35 = vmin.f32 %v1169_v34, 6.0 }
 0x17e   : > { %1243 = vst.msk [vmem:[%s2551_s14 + $0x18] sm:$0xf] %vm1236_vm4, %v1696_v29  ;;  %v1697_v39 = vpack.c.bf16 %v1183_v10, %v1183_v10 }
 0x17f   : > { %1241 = vst.msk [vmem:[%s2551_s14 + $0x10] sm:$0xf] %vm1236_vm4, %v1694_v38  ;;  %v1695_v40 = vpack.c.bf16 %v1181_v35, %v1181_v35 }
 0x180   : > { %1244 = vst.msk [vmem:[%s2551_s14 + $0x1c] sm:$0xf] %vm1236_vm4, %v1697_v39 }
 0x181   : > { %1242 = vst.msk [vmem:[%s2551_s14 + $0x14] sm:$0xf] %vm1236_vm4, %v1695_v40 }
 0x187   : > { %v1759_v13 = vpop.f32.mrb[4].mxu1 }
 0x188   : > { %v1500_v41 = vadd.f32 %v1759_v13, %v2542_v18  ;;  %v1491_v14 = vpop.f32.mrb[5].mxu1 }
 0x189   : > { %v1492_v5 = vadd.f32 %v2542_v18, %v1491_v14  ;;  %v1760_v42 = vpop.f32.mrb[6].mxu1 }
 0x18a   : > { %v1508_v43 = vmax.f32 %v1500_v41, 0.0  ;;  %v1503_v44 = vadd.f32 %v1760_v42, %v2542_v18  ;;  %v1494_v15 = vpop.f32.mrb[7].mxu1 }
 0x18b   : > { %v1506_v45 = vmax.f32 %v1492_v5, 0.0  ;;  %v1495_v47 = vadd.f32 %v2542_v18, %v1494_v15 }
 0x18c   : > { %v1512_v48 = vmin.f32 %v1508_v43, 6.0  ;;  %v1509_v58 = vmax.f32 %v1503_v44, 0.0 }
 0x18d   : > { %v1510_v60 = vmin.f32 %v1506_v45, 6.0  ;;  %v1507_v61 = vmax.f32 %v1495_v47, 0.0 }
 0x18e   : > { %v1704_v51 = vpack.c.bf16 %v1512_v48, %v1512_v48  ;;  %v1513_v16 = vmin.f32 %v1509_v58, 6.0 }
 0x18f   : > { %v1702_v63 = vpack.c.bf16 %v1510_v60, %v1510_v60  ;;  %v1511_v0 = vmin.f32 %v1507_v61, 6.0 }
 0x190   : > { %1532 = vst.msk [vmem:[%s2551_s14 + $0x38] sm:$0xf] %vm1236_vm4, %v1704_v51  ;;  %v1705_v2 = vpack.c.bf16 %v1513_v16, %v1513_v16 }
 0x191   : > { %1530 = vst.msk [vmem:[%s2551_s14 + $0x30] sm:$0xf] %vm1236_vm4, %v1702_v63  ;;  %v1703_v6 = vpack.c.bf16 %v1511_v0, %v1511_v0 }
 0x192   : > { %1533 = vst.msk [vmem:[%s2551_s14 + $0x3c] sm:$0xf] %vm1236_vm4, %v1705_v2 }
 0x193   : > { %1531 = vst.msk [vmem:[%s2551_s14 + $0x34] sm:$0xf] %vm1236_vm4, %v1703_v6 }
 0x194 PF: > { %s15_s22 = sadd.s32 1, %s1848_s22   ;;  %s2619_s18 = smov %s1840_s20 }
 0x195   : > { %p12_p9 = scmp.ge.s32.totalorder %s15_s22, 6   ;;  %s2620_s19 = smov %s1844_s21 }
 0x196   : > { %s2621_s20 = smov %s2624_s23  ;;  %s2622_s21 = smov %s2628_s24 }
 0x197   :  { %14 = sbr.rel (!%p12_p9) target bundleno = 3 (0x3), region = 73 }

</bundles_post_ra>
